<compile_context>
chip_gen: v7x
topology: tpu7x:2x2x1
jax: 0.10.0
libtpu: 0.0.40
codegen_flags: <defaults>
</compile_context>

<pallas_src>
import functools
import inspect
import math

import jax
import jax.numpy as jnp
from jax import lax
from jax.experimental import pallas as pl
from jax.experimental.pallas import tpu as pltpu


_LN_EPS = 1e-3          # nn.LayerNorm(input_dim, eps=0.001)
_SQRT2 = math.sqrt(2.0)


def _layernorm(v, w, b, eps=_LN_EPS):
    mu = jnp.mean(v, axis=-1, keepdims=True)
    var = jnp.mean(jnp.square(v - mu), axis=-1, keepdims=True)
    return (v - mu) * lax.rsqrt(var + eps) * w + b


def _gelu_exact(v):
    # F.gelu default (erf-based, exact)
    return 0.5 * v * (1.0 + lax.erf(v / _SQRT2))


def _gelu_tanh(v):
    return jax.nn.gelu(v, approximate=True)


# --------------------------------- kernel ------------------------------------------
def vit_block_kernel(num_heads, heads_per_group, mlp_chunk,
                     cache_kv, approx_gelu, approx_recip,
                     # inputs
                     xq_ref, xf_ref,
                     ln1w_ref, ln1b_ref,
                     wqkv_ref, bqkv_ref,
                     wout_ref, bout_ref,
                     skip1_ref,
                     ln2w_ref, ln2b_ref,
                     w1_ref, b1_ref,
                     w2_ref, b2_ref,
                     skip2_ref,
                     # output
                     o_ref,
                     # scratch
                     hf_scr, q3_scr, k_scr, v_scr, heads_scr):
    f32, bf16 = jnp.float32, jnp.bfloat16
    S, D = hf_scr.shape
    block_s = heads_scr.shape[0]
    hd = D // num_heads
    mlp_dim = w1_ref.shape[1]
    t = pl.program_id(1)

    # ---- LN1(full sequence) + K/V projection, computed once per batch ----
    def compute_kv():
        xf = xf_ref[0].astype(f32)                                   # (S, D)
        hf = _layernorm(xf, ln1w_ref[...], ln1b_ref[...])            # (S, D) f32
        hf_scr[...] = hf
        kv = jnp.dot(hf.astype(bf16), wqkv_ref[:, D:],
                     preferred_element_type=f32) + bqkv_ref[:, D:]   # (S, 2D)
        for h in range(num_heads):                                   # head-major cache
            lo = h * hd
            k_scr[h] = kv[:, lo:lo + hd].astype(bf16)
            v_scr[h] = kv[:, D + lo:D + lo + hd].astype(bf16)

    if cache_kv:
        pl.when(t == 0)(compute_kv)
    else:
        compute_kv()

    # ---- Q projection for this query tile (reuses cached LN1 rows) ----
    start = pl.multiple_of(t * block_s, block_s)
    hq = hf_scr[pl.ds(start, block_s), :].astype(bf16)               # (Sq, D)
    q = jnp.dot(hq, wqkv_ref[:, :D], preferred_element_type=f32) + bqkv_ref[:, :D]
    for h in range(num_heads):
        q3_scr[h] = q[:, h * hd:(h + 1) * hd].astype(bf16)           # head-major

    # ---- attention: batched einsum over head groups of ~128 lanes ----
    # TODO(synk): switch to lax.fori_loop over groups if num_heads/heads_per_group >= 8.
    for g0 in range(0, num_heads, heads_per_group):
        g1 = g0 + heads_per_group
        qg = q3_scr[g0:g1]                                           # (G, Sq, hd) bf16
        kg = k_scr[g0:g1]                                            # (G, S,  hd) bf16
        vg = v_scr[g0:g1]                                            # (G, S,  hd) bf16
        s = jnp.einsum('gqd,gkd->gqk', qg, kg,
                       preferred_element_type=f32)                   # (G, Sq, S)
        s = s - jnp.max(s, axis=-1, keepdims=True)
        p = jnp.exp(s)
        denom = jnp.sum(p, axis=-1, keepdims=True)
        if approx_recip:
            # ~1e-3-level deviation from exact softmax; EUP slot is otherwise idle.
            p = p * pl.reciprocal(denom, approx=True)
        else:
            p = p / denom
        og = jnp.einsum('gqk,gkd->gqd', p.astype(bf16), vg,
                        preferred_element_type=f32)                  # (G, Sq, hd)
        for j in range(heads_per_group):
            lo = (g0 + j) * hd
            heads_scr[:, lo:lo + hd] = og[j]

    # ---- single K=D output projection + layerscale + residual ----
    attn = jnp.dot(heads_scr[...].astype(bf16), wout_ref[...],
                   preferred_element_type=f32) + bout_ref[...]
    xq = xq_ref[0].astype(f32)
    x1 = attn * skip1_ref[...] + xq

    # ---- LayerNorm 2 + chunked MLP ----
    h2 = _layernorm(x1, ln2w_ref[...], ln2b_ref[...]).astype(bf16)
    gelu = _gelu_tanh if approx_gelu else _gelu_exact
    mlp = jnp.zeros_like(x1)
    for c0 in range(0, mlp_dim, mlp_chunk):
        c1 = c0 + mlp_chunk
        m = jnp.dot(h2, w1_ref[:, c0:c1],
                    preferred_element_type=f32) + b1_ref[:, c0:c1]
        m = gelu(m)
        mlp = mlp + jnp.dot(m.astype(bf16), w2_ref[c0:c1, :],
                            preferred_element_type=f32)
    mlp = mlp + b2_ref[...]

    o_ref[0] = (mlp * skip2_ref[...] + x1).astype(o_ref.dtype)


# --------------------------------- wrapper ------------------------------------------
def _physical_vmem_bytes():
    try:
        return int(pltpu.get_tpu_info().vmem_capacity_bytes)
    except Exception:  # hardware query unavailable (e.g. interpret mode) -> assume 128 MiB parts
        return 128 << 20


def _supports_buffered():
    if not hasattr(pl, "Buffered"):
        return False
    for target in (pl.BlockSpec, getattr(pl.BlockSpec, "__init__", None)):
        if target is None:
            continue
        try:
            if "pipeline_mode" in inspect.signature(target).parameters:
                return True
        except (TypeError, ValueError):
            continue
    return False


def _default_block_s(S):
    # v7x (64 MiB/TC) -> ~256; v5e/v6e (128 MiB) -> ~512; full sequence if small.
    target = 256 if _physical_vmem_bytes() <= (64 << 20) else 512
    if S <= target:
        return S
    for bs in range(target, 7, -8):
        if S % bs == 0:
            return bs
    return S


def _default_mlp_chunk(mlp_dim, target=2048):
    if mlp_dim <= target:
        return mlp_dim
    for c in range(target, 127, -128):
        if mlp_dim % c == 0:
            return c
    return mlp_dim


def _vmem_limit_bytes(S, D, mlp_dim, block_s, mlp_chunk, num_heads,
                      heads_per_group, x_itemsize, out_itemsize):
    """Explicit accounting of the buffers the kernel allocates."""
    bf16, f32 = 2, 4
    hd = D // num_heads
    weights = bf16 * (3 * D * D + D * D + 2 * D * mlp_dim)            # single-buffered
    vectors = 2 * f32 * (7 * D + 3 * D + mlp_dim)                     # small (1, ·) consts
    act_in = 2 * x_itemsize * (block_s * D + S * D)                   # query tile + full seq
    act_out = 2 * out_itemsize * block_s * D
    scratch = (f32 * S * D                                            # LN1 cache
               + bf16 * num_heads * (block_s + 2 * S) * hd            # q3 / k / v
               + f32 * block_s * D)                                   # head outputs
    transient = f32 * (heads_per_group * block_s * S                  # score block
                       + 2 * S * D                                    # kv projection
                       + 4 * block_s * D                              # q / attn / x1 / h2
                       + 2 * block_s * mlp_chunk)                     # fc1 chunk + gelu
    need = weights + vectors + act_in + act_out + scratch + transient
    cap = _physical_vmem_bytes()
    if need > cap:
        raise ValueError(
            f"ViT block kernel needs ~{need >> 20} MiB VMEM but only "
            f"{cap >> 20} MiB is available; reduce block_s / mlp_chunk.")
    return int(max(32 << 20, min(cap * 9 // 10, int(need * 1.5) + (4 << 20))))


def vit_block(x, params, num_heads, *, block_s=None, mlp_chunk=None,
              cache_kv=True, approx_gelu=False, approx_softmax_recip=True):
    """x: (B, S, D); params: dict of pre-transposed weights (bf16 matrices)."""
    B, S, D = x.shape
    assert D % num_heads == 0
    hd = D // num_heads
    mlp_dim = params["w1_t"].shape[1]

    if block_s is None:
        block_s = _default_block_s(S)
    if block_s <= 0 or S % block_s != 0 or (block_s % 8 != 0 and block_s != S):
        block_s = S
    n_t = S // block_s

    heads_per_group = max(1, min(num_heads, 128 // hd)) if hd < 128 else 1
    while num_heads % heads_per_group:
        heads_per_group -= 1

    if mlp_chunk is None:
        mlp_chunk = _default_mlp_chunk(mlp_dim)
    if mlp_dim % mlp_chunk != 0:
        mlp_chunk = mlp_dim

    buffered_kw = dict(pipeline_mode=pl.Buffered(1)) if _supports_buffered() else {}

    def const_spec(shape):
        # Grid-invariant operand: constant index_map, single-buffered when supported.
        return pl.BlockSpec(shape, lambda b, t: (0, 0), **buffered_kw)

    in_specs = [
        pl.BlockSpec((1, block_s, D), lambda b, t: (b, t, 0)),     # x (query/residual tile)
        pl.BlockSpec((1, S, D), lambda b, t: (b, 0, 0)),           # x (full sequence, K/V)
        const_spec((1, D)), const_spec((1, D)),                    # ln1 w, b
        const_spec((D, 3 * D)), const_spec((1, 3 * D)),            # qkv W^T (bf16), b
        const_spec((D, D)), const_spec((1, D)),                    # out-proj W^T (bf16), b
        const_spec((1, D)),                                        # skip1
        const_spec((1, D)), const_spec((1, D)),                    # ln2 w, b
        const_spec((D, mlp_dim)), const_spec((1, mlp_dim)),        # fc1 W^T (bf16), b
        const_spec((mlp_dim, D)), const_spec((1, D)),              # fc2 W^T (bf16), b
        const_spec((1, D)),                                        # skip2
    ]

    scratch_shapes = [
        pltpu.VMEM((S, D), jnp.float32),                           # LN1(x) cache
        pltpu.VMEM((num_heads, block_s, hd), jnp.bfloat16),        # q, head-major
        pltpu.VMEM((num_heads, S, hd), jnp.bfloat16),              # k cache, head-major
        pltpu.VMEM((num_heads, S, hd), jnp.bfloat16),              # v cache, head-major
        pltpu.VMEM((block_s, D), jnp.float32),                     # per-head attention out
    ]

    kernel = functools.partial(
        vit_block_kernel, num_heads, heads_per_group, mlp_chunk,
        bool(cache_kv), bool(approx_gelu), bool(approx_softmax_recip))

    # TODO(synk): for B=1 on v7x, prefer cache_kv=False (both axes parallel) or hoist
    # the LN1+QKV projection into its own pallas_call so both TensorCores get work.
    dim_sem = ("parallel", "arbitrary" if cache_kv else "parallel")

    vmem_limit = _vmem_limit_bytes(S, D, mlp_dim, block_s, mlp_chunk, num_heads,
                                   heads_per_group, x.dtype.itemsize, x.dtype.itemsize)

    return pl.pallas_call(
        kernel,
        out_shape=jax.ShapeDtypeStruct((B, S, D), x.dtype),
        grid=(B, n_t),
        in_specs=in_specs,
        out_specs=pl.BlockSpec((1, block_s, D), lambda b, t: (b, t, 0)),
        scratch_shapes=scratch_shapes,
        compiler_params=pltpu.CompilerParams(
            dimension_semantics=dim_sem,
            vmem_limit_bytes=vmem_limit),
    )(
        x, x,
        params["ln1_w"], params["ln1_b"],
        params["wqkv_t"], params["bqkv"],
        params["wout_t"], params["bout"],
        params["skip1"],
        params["ln2_w"], params["ln2_b"],
        params["w1_t"], params["b1"],
        params["w2_t"], params["b2"],
        params["skip2"],
    )


# ----------------------- pure-JAX reference for verification -----------------------
def vit_block_ref(x, params, num_heads, emulate_bf16=True):
    B, S, D = x.shape
    hd = D // num_heads
    f32 = jnp.float32

    def c(a):  # emulate the kernel's bf16 matmul operands (f32 accumulation)
        a = a.astype(f32)
        return a.astype(jnp.bfloat16).astype(f32) if emulate_bf16 else a

    def ln(v, w, b):
        mu = jnp.mean(v, axis=-1, keepdims=True)
        var = jnp.mean((v - mu) ** 2, axis=-1, keepdims=True)
        return (v - mu) / jnp.sqrt(var + _LN_EPS) * w[0] + b[0]

    wqkv = params["wqkv_t"].astype(f32)
    wout = params["wout_t"].astype(f32)
    w1 = params["w1_t"].astype(f32)
    w2 = params["w2_t"].astype(f32)

    h = ln(x, params["ln1_w"], params["ln1_b"])
    qkv = c(h) @ c(wqkv) + params["bqkv"][0]
    q, k, v = qkv[..., :D], qkv[..., D:2 * D], qkv[..., 2 * D:]
    q = q.reshape(B, S, num_heads, hd).transpose(0, 2, 1, 3)  # scale already folded
    k = k.reshape(B, S, num_heads, hd).transpose(0, 2, 1, 3)
    v = v.reshape(B, S, num_heads, hd).transpose(0, 2, 1, 3)
    s = jnp.einsum("bhqd,bhkd->bhqk", c(q), c(k))
    p = jax.nn.softmax(s, axis=-1)
    attn = jnp.einsum("bhqk,bhkd->bhqd", c(p), c(v)).transpose(0, 2, 1, 3).reshape(B, S, D)
    attn = c(attn) @ c(wout) + params["bout"][0]
    x1 = attn * params["skip1"][0] + x
    h2 = ln(x1, params["ln2_w"], params["ln2_b"])
    m = c(h2) @ c(w1) + params["b1"][0]
    m = 0.5 * m * (1.0 + lax.erf(m / _SQRT2))
    m = c(m) @ c(w2) + params["b2"][0]
    return m * params["skip2"][0] + x1


# ----------------------------------- main -----------------------------------------
if __name__ == "__main__":
    # Small but lane-friendly shapes: D, mlp multiples of 128; S multiple of 8.
    B, S = 2, 16
    D = 128            # input_dim == key_dim (channelwise skip broadcasts over D)
    heads = 4          # head_dim = 32  -> one head-group of 4 heads (128 lanes)
    mlp_dim = 256
    layerscale_init = 1.0
    # stochdepth_rate = 0.0 -> StochDepth identity (eval mode) regardless.

    key = jax.random.PRNGKey(0)
    ks = jax.random.split(key, 14)

    hd = D // heads
    scale = 1.0 / math.sqrt(hd)

    # PyTorch-layout weights (then transposed for row-major h @ W in the kernel).
    wqkv = jax.random.normal(ks[0], (3 * D, D), jnp.float32) * 0.05   # in_proj_weight
    bqkv = jax.random.normal(ks[1], (3 * D,), jnp.float32) * 0.05
    wout = jax.random.normal(ks[2], (D, D), jnp.float32) * 0.05       # out_proj.weight
    bout = jax.random.normal(ks[3], (D,), jnp.float32) * 0.05
    w1 = jax.random.normal(ks[4], (mlp_dim, D), jnp.float32) * 0.05   # fc1.weight
    b1 = jax.random.normal(ks[5], (mlp_dim,), jnp.float32) * 0.05
    w2 = jax.random.normal(ks[6], (D, mlp_dim), jnp.float32) * 0.05   # fc2.weight
    b2 = jax.random.normal(ks[7], (D,), jnp.float32) * 0.05

    # Fold the 1/sqrt(head_dim) attention scale into the Q projection (W and b).
    wqkv_t = wqkv.T
    wqkv_t = wqkv_t.at[:, :D].multiply(scale)
    bqkv_f = bqkv.at[:D].multiply(scale)

    params = {
        "ln1_w": (1.0 + 0.1 * jax.random.normal(ks[9], (1, D), jnp.float32)),
        "ln1_b": 0.1 * jax.random.normal(ks[10], (1, D), jnp.float32),
        "wqkv_t": wqkv_t.astype(jnp.bfloat16),        # bf16 weights in HBM
        "bqkv": bqkv_f.reshape(1, 3 * D),
        "wout_t": wout.T.astype(jnp.bfloat16),
        "bout": bout.reshape(1, D),
        "skip1": jnp.full((1, D), layerscale_init, jnp.float32),
        "ln2_w": (1.0 + 0.1 * jax.random.normal(ks[11], (1, D), jnp.float32)),
        "ln2_b": 0.1 * jax.random.normal(ks[12], (1, D), jnp.float32),
        "w1_t": w1.T.astype(jnp.bfloat16),
        "b1": b1.reshape(1, mlp_dim),
        "w2_t": w2.T.astype(jnp.bfloat16),
        "b2": b2.reshape(1, D),
        "skip2": jnp.full((1, D), layerscale_init, jnp.float32),
    }

    x = jax.random.normal(ks[8], (B, S, D), jnp.float32)
    # TODO(synk): on v5e, pass x (and the output) as bf16 to halve activation DMA bytes.

    ref = vit_block_ref(x, params, heads)

    # Exercise: full-sequence tile, query-tiled with cached K/V, and the
    # "parallel seq axis" (no caching) variant.
    configs = [
        dict(block_s=None),
        dict(block_s=8),
        dict(block_s=8, cache_kv=False),
    ]
    for cfg in configs:
        out = jax.block_until_ready(vit_block(x, params, heads, **cfg))
        assert out.shape == (B, S, D)
        err = float(jnp.max(jnp.abs(out - ref)))
        assert jnp.allclose(out, ref, atol=1e-2, rtol=1e-2), (
            f"cfg={cfg}: max abs err {err}")

    print("KERNEL_OK")
</pallas_src>

<mosaic_0001>
module attributes {stable_mosaic.version = 11 : i64} {
  func.func @vit_block_kernel(%arg0: i32, %arg1: i32, %arg2: memref<1x16x128xf32, #tpu.memory_space<vmem>>, %arg3: memref<1x16x128xf32, #tpu.memory_space<vmem>>, %arg4: memref<1x128xf32, #tpu.memory_space<vmem>>, %arg5: memref<1x128xf32, #tpu.memory_space<vmem>>, %arg6: memref<128x384xbf16, #tpu.memory_space<vmem>>, %arg7: memref<1x384xf32, #tpu.memory_space<vmem>>, %arg8: memref<128x128xbf16, #tpu.memory_space<vmem>>, %arg9: memref<1x128xf32, #tpu.memory_space<vmem>>, %arg10: memref<1x128xf32, #tpu.memory_space<vmem>>, %arg11: memref<1x128xf32, #tpu.memory_space<vmem>>, %arg12: memref<1x128xf32, #tpu.memory_space<vmem>>, %arg13: memref<128x256xbf16, #tpu.memory_space<vmem>>, %arg14: memref<1x256xf32, #tpu.memory_space<vmem>>, %arg15: memref<256x128xbf16, #tpu.memory_space<vmem>>, %arg16: memref<1x128xf32, #tpu.memory_space<vmem>>, %arg17: memref<1x128xf32, #tpu.memory_space<vmem>>, %arg18: memref<1x16x128xf32, #tpu.memory_space<vmem>>, %arg19: memref<16x128xf32, #tpu.memory_space<vmem>>, %arg20: memref<4x16x32xbf16, #tpu.memory_space<vmem>>, %arg21: memref<4x16x32xbf16, #tpu.memory_space<vmem>>, %arg22: memref<4x16x32xbf16, #tpu.memory_space<vmem>>, %arg23: memref<16x128xf32, #tpu.memory_space<vmem>>) attributes {dimension_semantics = [#tpu.dimension_semantics<parallel>, #tpu.dimension_semantics<arbitrary>], iteration_bounds = array<i64: 2, 1>, scalar_prefetch = 0 : i64, scratch_operands = 5 : i64, tpu.core_type = #tpu.core_type<tc>, window_params = [{transform_indices = @transform_0, window_bounds = array<i64: 1, 16, 128>}, {transform_indices = @transform_1, window_bounds = array<i64: 1, 16, 128>}, {pipeline_mode = #tpu.pipeline_mode<synchronous>, transform_indices = @transform_2, window_bounds = array<i64: 1, 128>}, {pipeline_mode = #tpu.pipeline_mode<synchronous>, transform_indices = @transform_3, window_bounds = array<i64: 1, 128>}, {pipeline_mode = #tpu.pipeline_mode<synchronous>, transform_indices = @transform_4, window_bounds = array<i64: 128, 384>}, {pipeline_mode = #tpu.pipeline_mode<synchronous>, transform_indices = @transform_5, window_bounds = array<i64: 1, 384>}, {pipeline_mode = #tpu.pipeline_mode<synchronous>, transform_indices = @transform_6, window_bounds = array<i64: 128, 128>}, {pipeline_mode = #tpu.pipeline_mode<synchronous>, transform_indices = @transform_7, window_bounds = array<i64: 1, 128>}, {pipeline_mode = #tpu.pipeline_mode<synchronous>, transform_indices = @transform_8, window_bounds = array<i64: 1, 128>}, {pipeline_mode = #tpu.pipeline_mode<synchronous>, transform_indices = @transform_9, window_bounds = array<i64: 1, 128>}, {pipeline_mode = #tpu.pipeline_mode<synchronous>, transform_indices = @transform_10, window_bounds = array<i64: 1, 128>}, {pipeline_mode = #tpu.pipeline_mode<synchronous>, transform_indices = @transform_11, window_bounds = array<i64: 128, 256>}, {pipeline_mode = #tpu.pipeline_mode<synchronous>, transform_indices = @transform_12, window_bounds = array<i64: 1, 256>}, {pipeline_mode = #tpu.pipeline_mode<synchronous>, transform_indices = @transform_13, window_bounds = array<i64: 256, 128>}, {pipeline_mode = #tpu.pipeline_mode<synchronous>, transform_indices = @transform_14, window_bounds = array<i64: 1, 128>}, {pipeline_mode = #tpu.pipeline_mode<synchronous>, transform_indices = @transform_15, window_bounds = array<i64: 1, 128>}, {transform_indices = @transform_16, window_bounds = array<i64: 1, 16, 128>}]} {
    %c0_i32 = arith.constant 0 : i32
    %0 = arith.cmpi eq, %arg1, %c0_i32 : i32
    %1 = arith.extui %0 : i1 to i32
    %c0_i32_0 = arith.constant 0 : i32
    %2 = arith.cmpi ne, %1, %c0_i32_0 : i32
    scf.if %2 {
      %c0_72 = arith.constant 0 : index
      %c0_73 = arith.constant 0 : index
      %c0_74 = arith.constant 0 : index
      %127 = vector.load %arg3[%c0_72, %c0_73, %c0_74] : memref<1x16x128xf32, #tpu.memory_space<vmem>>, vector<1x16x128xf32>
      %128 = vector.shape_cast %127 : vector<1x16x128xf32> to vector<16x128xf32>
      %c0_75 = arith.constant 0 : index
      %c0_76 = arith.constant 0 : index
      %129 = vector.load %arg4[%c0_75, %c0_76] : memref<1x128xf32, #tpu.memory_space<vmem>>, vector<1x128xf32>
      %c0_77 = arith.constant 0 : index
      %c0_78 = arith.constant 0 : index
      %130 = vector.load %arg5[%c0_77, %c0_78] : memref<1x128xf32, #tpu.memory_space<vmem>>, vector<1x128xf32>
      %cst_79 = arith.constant dense<0.000000e+00> : vector<16xf32>
      %131 = vector.multi_reduction <add>, %128, %cst_79 [1] : vector<16x128xf32> to vector<16xf32>
      %132 = vector.shape_cast %131 : vector<16xf32> to vector<16x1xf32>
      %cst_80 = arith.constant 1.280000e+02 : f32
      %133 = vector.broadcast %cst_80 : f32 to vector<16x1xf32>
      %134 = arith.divf %132, %133 : vector<16x1xf32>
      %135 = vector.broadcast %134 : vector<16x1xf32> to vector<16x128xf32>
      %136 = arith.subf %128, %135 : vector<16x128xf32>
      %137 = arith.mulf %136, %136 : vector<16x128xf32>
      %cst_81 = arith.constant dense<0.000000e+00> : vector<16xf32>
      %138 = vector.multi_reduction <add>, %137, %cst_81 [1] : vector<16x128xf32> to vector<16xf32>
      %139 = vector.shape_cast %138 : vector<16xf32> to vector<16x1xf32>
      %cst_82 = arith.constant 1.280000e+02 : f32
      %140 = vector.broadcast %cst_82 : f32 to vector<16x1xf32>
      %141 = arith.divf %139, %140 : vector<16x1xf32>
      %142 = vector.broadcast %134 : vector<16x1xf32> to vector<16x128xf32>
      %143 = arith.subf %128, %142 : vector<16x128xf32>
      %cst_83 = arith.constant 1.000000e-03 : f32
      %144 = vector.broadcast %cst_83 : f32 to vector<16x1xf32>
      %145 = arith.addf %141, %144 : vector<16x1xf32>
      %146 = math.rsqrt %145 : vector<16x1xf32>
      %147 = vector.broadcast %146 : vector<16x1xf32> to vector<16x128xf32>
      %148 = arith.mulf %143, %147 : vector<16x128xf32>
      %149 = vector.broadcast %129 : vector<1x128xf32> to vector<16x128xf32>
      %150 = arith.mulf %148, %149 : vector<16x128xf32>
      %151 = vector.broadcast %130 : vector<1x128xf32> to vector<16x128xf32>
      %152 = arith.addf %150, %151 : vector<16x128xf32>
      %c0_84 = arith.constant 0 : index
      %c0_85 = arith.constant 0 : index
      %153 = vector.load %arg19[%c0_84, %c0_85] : memref<16x128xf32, #tpu.memory_space<vmem>>, vector<16x128xf32>
      tpu.vector_store %arg19[%c0_84, %c0_85], %152 {strides = array<i32>} : memref<16x128xf32, #tpu.memory_space<vmem>>, vector<16x128xf32>,
      %154 = arith.truncf %152 : vector<16x128xf32> to vector<16x128xbf16>
      %c0_86 = arith.constant 0 : index
      %c128 = arith.constant 128 : index
      %155 = vector.load %arg6[%c0_86, %c128] : memref<128x384xbf16, #tpu.memory_space<vmem>>, vector<128x256xbf16>
      %cst_87 = arith.constant dense<0.000000e+00> : vector<16x256xf32>
      %156 = tpu.matmul %154, %155, %cst_87 {dimension_numbers = #tpu.dot_dimension_numbers<[1], [0], [0], [1], [0, 0, 1, 1], [], []>} : vector<16x128xbf16>, vector<128x256xbf16>, vector<16x256xf32> -> vector<16x256xf32>
      %c0_88 = arith.constant 0 : index
      %c128_89 = arith.constant 128 : index
      %157 = vector.load %arg7[%c0_88, %c128_89] : memref<1x384xf32, #tpu.memory_space<vmem>>, vector<1x256xf32>
      %158 = vector.broadcast %157 : vector<1x256xf32> to vector<16x256xf32>
      %159 = arith.addf %156, %158 : vector<16x256xf32>
      %160 = vector.extract_strided_slice %159 {offsets = [0, 0], sizes = [16, 32], strides = [1, 1]} : vector<16x256xf32> to vector<16x32xf32>
      %161 = arith.truncf %160 : vector<16x32xf32> to vector<16x32xbf16>
      %c0_90 = arith.constant 0 : index
      %c0_91 = arith.constant 0 : index
      %c0_92 = arith.constant 0 : index
      %162 = vector.load %arg21[%c0_90, %c0_91, %c0_92] : memref<4x16x32xbf16, #tpu.memory_space<vmem>>, vector<1x16x32xbf16>
      %163 = vector.shape_cast %162 : vector<1x16x32xbf16> to vector<16x32xbf16>
      %164 = vector.shape_cast %161 : vector<16x32xbf16> to vector<1x16x32xbf16>
      tpu.vector_store %arg21[%c0_90, %c0_91, %c0_92], %164 {strides = array<i32>} : memref<4x16x32xbf16, #tpu.memory_space<vmem>>, vector<1x16x32xbf16>,
      %165 = vector.extract_strided_slice %159 {offsets = [0, 128], sizes = [16, 32], strides = [1, 1]} : vector<16x256xf32> to vector<16x32xf32>
      %166 = arith.truncf %165 : vector<16x32xf32> to vector<16x32xbf16>
      %c0_93 = arith.constant 0 : index
      %c0_94 = arith.constant 0 : index
      %c0_95 = arith.constant 0 : index
      %167 = vector.load %arg22[%c0_93, %c0_94, %c0_95] : memref<4x16x32xbf16, #tpu.memory_space<vmem>>, vector<1x16x32xbf16>
      %168 = vector.shape_cast %167 : vector<1x16x32xbf16> to vector<16x32xbf16>
      %169 = vector.shape_cast %166 : vector<16x32xbf16> to vector<1x16x32xbf16>
      tpu.vector_store %arg22[%c0_93, %c0_94, %c0_95], %169 {strides = array<i32>} : memref<4x16x32xbf16, #tpu.memory_space<vmem>>, vector<1x16x32xbf16>,
      %170 = vector.extract_strided_slice %159 {offsets = [0, 32], sizes = [16, 32], strides = [1, 1]} : vector<16x256xf32> to vector<16x32xf32>
      %171 = arith.truncf %170 : vector<16x32xf32> to vector<16x32xbf16>
      %c1_96 = arith.constant 1 : index
      %c0_97 = arith.constant 0 : index
      %c0_98 = arith.constant 0 : index
      %172 = vector.load %arg21[%c1_96, %c0_97, %c0_98] : memref<4x16x32xbf16, #tpu.memory_space<vmem>>, vector<1x16x32xbf16>
      %173 = vector.shape_cast %172 : vector<1x16x32xbf16> to vector<16x32xbf16>
      %174 = vector.shape_cast %171 : vector<16x32xbf16> to vector<1x16x32xbf16>
      tpu.vector_store %arg21[%c1_96, %c0_97, %c0_98], %174 {strides = array<i32>} : memref<4x16x32xbf16, #tpu.memory_space<vmem>>, vector<1x16x32xbf16>,
      %175 = vector.extract_strided_slice %159 {offsets = [0, 160], sizes = [16, 32], strides = [1, 1]} : vector<16x256xf32> to vector<16x32xf32>
      %176 = arith.truncf %175 : vector<16x32xf32> to vector<16x32xbf16>
      %c1_99 = arith.constant 1 : index
      %c0_100 = arith.constant 0 : index
      %c0_101 = arith.constant 0 : index
      %177 = vector.load %arg22[%c1_99, %c0_100, %c0_101] : memref<4x16x32xbf16, #tpu.memory_space<vmem>>, vector<1x16x32xbf16>
      %178 = vector.shape_cast %177 : vector<1x16x32xbf16> to vector<16x32xbf16>
      %179 = vector.shape_cast %176 : vector<16x32xbf16> to vector<1x16x32xbf16>
      tpu.vector_store %arg22[%c1_99, %c0_100, %c0_101], %179 {strides = array<i32>} : memref<4x16x32xbf16, #tpu.memory_space<vmem>>, vector<1x16x32xbf16>,
      %180 = vector.extract_strided_slice %159 {offsets = [0, 64], sizes = [16, 32], strides = [1, 1]} : vector<16x256xf32> to vector<16x32xf32>
      %181 = arith.truncf %180 : vector<16x32xf32> to vector<16x32xbf16>
      %c2_102 = arith.constant 2 : index
      %c0_103 = arith.constant 0 : index
      %c0_104 = arith.constant 0 : index
      %182 = vector.load %arg21[%c2_102, %c0_103, %c0_104] : memref<4x16x32xbf16, #tpu.memory_space<vmem>>, vector<1x16x32xbf16>
      %183 = vector.shape_cast %182 : vector<1x16x32xbf16> to vector<16x32xbf16>
      %184 = vector.shape_cast %181 : vector<16x32xbf16> to vector<1x16x32xbf16>
      tpu.vector_store %arg21[%c2_102, %c0_103, %c0_104], %184 {strides = array<i32>} : memref<4x16x32xbf16, #tpu.memory_space<vmem>>, vector<1x16x32xbf16>,
      %185 = vector.extract_strided_slice %159 {offsets = [0, 192], sizes = [16, 32], strides = [1, 1]} : vector<16x256xf32> to vector<16x32xf32>
      %186 = arith.truncf %185 : vector<16x32xf32> to vector<16x32xbf16>
      %c2_105 = arith.constant 2 : index
      %c0_106 = arith.constant 0 : index
      %c0_107 = arith.constant 0 : index
      %187 = vector.load %arg22[%c2_105, %c0_106, %c0_107] : memref<4x16x32xbf16, #tpu.memory_space<vmem>>, vector<1x16x32xbf16>
      %188 = vector.shape_cast %187 : vector<1x16x32xbf16> to vector<16x32xbf16>
      %189 = vector.shape_cast %186 : vector<16x32xbf16> to vector<1x16x32xbf16>
      tpu.vector_store %arg22[%c2_105, %c0_106, %c0_107], %189 {strides = array<i32>} : memref<4x16x32xbf16, #tpu.memory_space<vmem>>, vector<1x16x32xbf16>,
      %190 = vector.extract_strided_slice %159 {offsets = [0, 96], sizes = [16, 32], strides = [1, 1]} : vector<16x256xf32> to vector<16x32xf32>
      %191 = arith.truncf %190 : vector<16x32xf32> to vector<16x32xbf16>
      %c3_108 = arith.constant 3 : index
      %c0_109 = arith.constant 0 : index
      %c0_110 = arith.constant 0 : index
      %192 = vector.load %arg21[%c3_108, %c0_109, %c0_110] : memref<4x16x32xbf16, #tpu.memory_space<vmem>>, vector<1x16x32xbf16>
      %193 = vector.shape_cast %192 : vector<1x16x32xbf16> to vector<16x32xbf16>
      %194 = vector.shape_cast %191 : vector<16x32xbf16> to vector<1x16x32xbf16>
      tpu.vector_store %arg21[%c3_108, %c0_109, %c0_110], %194 {strides = array<i32>} : memref<4x16x32xbf16, #tpu.memory_space<vmem>>, vector<1x16x32xbf16>,
      %195 = vector.extract_strided_slice %159 {offsets = [0, 224], sizes = [16, 32], strides = [1, 1]} : vector<16x256xf32> to vector<16x32xf32>
      %196 = arith.truncf %195 : vector<16x32xf32> to vector<16x32xbf16>
      %c3_111 = arith.constant 3 : index
      %c0_112 = arith.constant 0 : index
      %c0_113 = arith.constant 0 : index
      %197 = vector.load %arg22[%c3_111, %c0_112, %c0_113] : memref<4x16x32xbf16, #tpu.memory_space<vmem>>, vector<1x16x32xbf16>
      %198 = vector.shape_cast %197 : vector<1x16x32xbf16> to vector<16x32xbf16>
      %199 = vector.shape_cast %196 : vector<16x32xbf16> to vector<1x16x32xbf16>
      tpu.vector_store %arg22[%c3_111, %c0_112, %c0_113], %199 {strides = array<i32>} : memref<4x16x32xbf16, #tpu.memory_space<vmem>>, vector<1x16x32xbf16>,
    } else {
    }
    %c16_i32 = arith.constant 16 : i32
    %3 = arith.muli %arg1, %c16_i32 : i32
    %4 = tpu.assume_multiple %3, 16 : i32
    %5 = arith.index_cast %4 : i32 to index
    %c0 = arith.constant 0 : index
    %6 = vector.load %arg19[%5, %c0] : memref<16x128xf32, #tpu.memory_space<vmem>>, vector<16x128xf32>
    %7 = arith.truncf %6 : vector<16x128xf32> to vector<16x128xbf16>
    %c0_1 = arith.constant 0 : index
    %c0_2 = arith.constant 0 : index
    %8 = vector.load %arg6[%c0_1, %c0_2] : memref<128x384xbf16, #tpu.memory_space<vmem>>, vector<128x128xbf16>
    %cst = arith.constant dense<0.000000e+00> : vector<16x128xf32>
    %9 = tpu.matmul %7, %8, %cst {dimension_numbers = #tpu.dot_dimension_numbers<[1], [0], [0], [1], [0, 0, 1, 1], [], []>} : vector<16x128xbf16>, vector<128x128xbf16>, vector<16x128xf32> -> vector<16x128xf32>
    %c0_3 = arith.constant 0 : index
    %c0_4 = arith.constant 0 : index
    %10 = vector.load %arg7[%c0_3, %c0_4] : memref<1x384xf32, #tpu.memory_space<vmem>>, vector<1x128xf32>
    %11 = vector.broadcast %10 : vector<1x128xf32> to vector<16x128xf32>
    %12 = arith.addf %9, %11 : vector<16x128xf32>
    %13 = vector.extract_strided_slice %12 {offsets = [0, 0], sizes = [16, 32], strides = [1, 1]} : vector<16x128xf32> to vector<16x32xf32>
    %14 = arith.truncf %13 : vector<16x32xf32> to vector<16x32xbf16>
    %c0_5 = arith.constant 0 : index
    %c0_6 = arith.constant 0 : index
    %c0_7 = arith.constant 0 : index
    %15 = vector.load %arg20[%c0_5, %c0_6, %c0_7] : memref<4x16x32xbf16, #tpu.memory_space<vmem>>, vector<1x16x32xbf16>
    %16 = vector.shape_cast %15 : vector<1x16x32xbf16> to vector<16x32xbf16>
    %17 = vector.shape_cast %14 : vector<16x32xbf16> to vector<1x16x32xbf16>
    tpu.vector_store %arg20[%c0_5, %c0_6, %c0_7], %17 {strides = array<i32>} : memref<4x16x32xbf16, #tpu.memory_space<vmem>>, vector<1x16x32xbf16>,
    %18 = vector.extract_strided_slice %12 {offsets = [0, 32], sizes = [16, 32], strides = [1, 1]} : vector<16x128xf32> to vector<16x32xf32>
    %19 = arith.truncf %18 : vector<16x32xf32> to vector<16x32xbf16>
    %c1 = arith.constant 1 : index
    %c0_8 = arith.constant 0 : index
    %c0_9 = arith.constant 0 : index
    %20 = vector.load %arg20[%c1, %c0_8, %c0_9] : memref<4x16x32xbf16, #tpu.memory_space<vmem>>, vector<1x16x32xbf16>
    %21 = vector.shape_cast %20 : vector<1x16x32xbf16> to vector<16x32xbf16>
    %22 = vector.shape_cast %19 : vector<16x32xbf16> to vector<1x16x32xbf16>
    tpu.vector_store %arg20[%c1, %c0_8, %c0_9], %22 {strides = array<i32>} : memref<4x16x32xbf16, #tpu.memory_space<vmem>>, vector<1x16x32xbf16>,
    %23 = vector.extract_strided_slice %12 {offsets = [0, 64], sizes = [16, 32], strides = [1, 1]} : vector<16x128xf32> to vector<16x32xf32>
    %24 = arith.truncf %23 : vector<16x32xf32> to vector<16x32xbf16>
    %c2 = arith.constant 2 : index
    %c0_10 = arith.constant 0 : index
    %c0_11 = arith.constant 0 : index
    %25 = vector.load %arg20[%c2, %c0_10, %c0_11] : memref<4x16x32xbf16, #tpu.memory_space<vmem>>, vector<1x16x32xbf16>
    %26 = vector.shape_cast %25 : vector<1x16x32xbf16> to vector<16x32xbf16>
    %27 = vector.shape_cast %24 : vector<16x32xbf16> to vector<1x16x32xbf16>
    tpu.vector_store %arg20[%c2, %c0_10, %c0_11], %27 {strides = array<i32>} : memref<4x16x32xbf16, #tpu.memory_space<vmem>>, vector<1x16x32xbf16>,
    %28 = vector.extract_strided_slice %12 {offsets = [0, 96], sizes = [16, 32], strides = [1, 1]} : vector<16x128xf32> to vector<16x32xf32>
    %29 = arith.truncf %28 : vector<16x32xf32> to vector<16x32xbf16>
    %c3 = arith.constant 3 : index
    %c0_12 = arith.constant 0 : index
    %c0_13 = arith.constant 0 : index
    %30 = vector.load %arg20[%c3, %c0_12, %c0_13] : memref<4x16x32xbf16, #tpu.memory_space<vmem>>, vector<1x16x32xbf16>
    %31 = vector.shape_cast %30 : vector<1x16x32xbf16> to vector<16x32xbf16>
    %32 = vector.shape_cast %29 : vector<16x32xbf16> to vector<1x16x32xbf16>
    tpu.vector_store %arg20[%c3, %c0_12, %c0_13], %32 {strides = array<i32>} : memref<4x16x32xbf16, #tpu.memory_space<vmem>>, vector<1x16x32xbf16>,
    %c0_14 = arith.constant 0 : index
    %c0_15 = arith.constant 0 : index
    %c0_16 = arith.constant 0 : index
    %33 = vector.load %arg20[%c0_14, %c0_15, %c0_16] : memref<4x16x32xbf16, #tpu.memory_space<vmem>>, vector<4x16x32xbf16>
    %c0_17 = arith.constant 0 : index
    %c0_18 = arith.constant 0 : index
    %c0_19 = arith.constant 0 : index
    %34 = vector.load %arg21[%c0_17, %c0_18, %c0_19] : memref<4x16x32xbf16, #tpu.memory_space<vmem>>, vector<4x16x32xbf16>
    %c0_20 = arith.constant 0 : index
    %c0_21 = arith.constant 0 : index
    %c0_22 = arith.constant 0 : index
    %35 = vector.load %arg22[%c0_20, %c0_21, %c0_22] : memref<4x16x32xbf16, #tpu.memory_space<vmem>>, vector<4x16x32xbf16>
    "tpu.trace_start"() <{level = 10 : i32, message = "gqd,gkd->gqk"}> : () -> ()
    %cst_23 = arith.constant dense<0.000000e+00> : vector<4x16x16xf32>
    %36 = tpu.matmul %33, %34, %cst_23 {dimension_numbers = #tpu.dot_dimension_numbers<[2], [2], [1], [1], [0, 0, 0, 1, 1, 1], [0], [0]>} : vector<4x16x32xbf16>, vector<4x16x32xbf16>, vector<4x16x16xf32> -> vector<4x16x16xf32>
    "tpu.trace_stop"() : () -> ()
    %cst_24 = arith.constant dense<0xFF800000> : vector<4x16xf32>
    %37 = vector.multi_reduction <maximumf>, %36, %cst_24 [2] : vector<4x16x16xf32> to vector<4x16xf32>
    %38 = vector.shape_cast %37 : vector<4x16xf32> to vector<4x16x1xf32>
    %39 = vector.broadcast %38 : vector<4x16x1xf32> to vector<4x16x16xf32>
    %40 = arith.subf %36, %39 : vector<4x16x16xf32>
    %41 = math.exp %40 : vector<4x16x16xf32>
    %cst_25 = arith.constant dense<0.000000e+00> : vector<4x16xf32>
    %42 = vector.multi_reduction <add>, %41, %cst_25 [2] : vector<4x16x16xf32> to vector<4x16xf32>
    %43 = vector.shape_cast %42 : vector<4x16xf32> to vector<4x16x1xf32>
    %44 = tpu.reciprocal %43 {approx = true} : vector<4x16x1xf32> -> vector<4x16x1xf32>
    %45 = vector.broadcast %44 : vector<4x16x1xf32> to vector<4x16x16xf32>
    %46 = arith.mulf %41, %45 : vector<4x16x16xf32>
    %47 = arith.truncf %46 : vector<4x16x16xf32> to vector<4x16x16xbf16>
    "tpu.trace_start"() <{level = 10 : i32, message = "gqk,gkd->gqd"}> : () -> ()
    %cst_26 = arith.constant dense<0.000000e+00> : vector<4x16x32xf32>
    %48 = tpu.matmul %47, %35, %cst_26 {dimension_numbers = #tpu.dot_dimension_numbers<[2], [1], [1], [2], [0, 0, 0, 1, 1, 2], [0], [0]>} : vector<4x16x16xbf16>, vector<4x16x32xbf16>, vector<4x16x32xf32> -> vector<4x16x32xf32>
    "tpu.trace_stop"() : () -> ()
    %49 = vector.extract_strided_slice %48 {offsets = [0, 0, 0], sizes = [1, 16, 32], strides = [1, 1, 1]} : vector<4x16x32xf32> to vector<1x16x32xf32>
    %50 = vector.shape_cast %49 : vector<1x16x32xf32> to vector<16x32xf32>
    %c0_27 = arith.constant 0 : index
    %c0_28 = arith.constant 0 : index
    %51 = vector.load %arg23[%c0_27, %c0_28] : memref<16x128xf32, #tpu.memory_space<vmem>>, vector<16x32xf32>
    tpu.vector_store %arg23[%c0_27, %c0_28], %50 {strides = array<i32>} : memref<16x128xf32, #tpu.memory_space<vmem>>, vector<16x32xf32>,
    %52 = vector.extract_strided_slice %48 {offsets = [1, 0, 0], sizes = [1, 16, 32], strides = [1, 1, 1]} : vector<4x16x32xf32> to vector<1x16x32xf32>
    %53 = vector.shape_cast %52 : vector<1x16x32xf32> to vector<16x32xf32>
    %c0_29 = arith.constant 0 : index
    %c32 = arith.constant 32 : index
    %54 = vector.load %arg23[%c0_29, %c32] : memref<16x128xf32, #tpu.memory_space<vmem>>, vector<16x32xf32>
    tpu.vector_store %arg23[%c0_29, %c32], %53 {strides = array<i32>} : memref<16x128xf32, #tpu.memory_space<vmem>>, vector<16x32xf32>,
    %55 = vector.extract_strided_slice %48 {offsets = [2, 0, 0], sizes = [1, 16, 32], strides = [1, 1, 1]} : vector<4x16x32xf32> to vector<1x16x32xf32>
    %56 = vector.shape_cast %55 : vector<1x16x32xf32> to vector<16x32xf32>
    %c0_30 = arith.constant 0 : index
    %c64 = arith.constant 64 : index
    %57 = vector.load %arg23[%c0_30, %c64] : memref<16x128xf32, #tpu.memory_space<vmem>>, vector<16x32xf32>
    tpu.vector_store %arg23[%c0_30, %c64], %56 {strides = array<i32>} : memref<16x128xf32, #tpu.memory_space<vmem>>, vector<16x32xf32>,
    %58 = vector.extract_strided_slice %48 {offsets = [3, 0, 0], sizes = [1, 16, 32], strides = [1, 1, 1]} : vector<4x16x32xf32> to vector<1x16x32xf32>
    %59 = vector.shape_cast %58 : vector<1x16x32xf32> to vector<16x32xf32>
    %c0_31 = arith.constant 0 : index
    %c96 = arith.constant 96 : index
    %60 = vector.load %arg23[%c0_31, %c96] : memref<16x128xf32, #tpu.memory_space<vmem>>, vector<16x32xf32>
    tpu.vector_store %arg23[%c0_31, %c96], %59 {strides = array<i32>} : memref<16x128xf32, #tpu.memory_space<vmem>>, vector<16x32xf32>,
    %c0_32 = arith.constant 0 : index
    %c0_33 = arith.constant 0 : index
    %61 = vector.load %arg23[%c0_32, %c0_33] : memref<16x128xf32, #tpu.memory_space<vmem>>, vector<16x128xf32>
    %62 = arith.truncf %61 : vector<16x128xf32> to vector<16x128xbf16>
    %c0_34 = arith.constant 0 : index
    %c0_35 = arith.constant 0 : index
    %63 = vector.load %arg8[%c0_34, %c0_35] : memref<128x128xbf16, #tpu.memory_space<vmem>>, vector<128x128xbf16>
    %cst_36 = arith.constant dense<0.000000e+00> : vector<16x128xf32>
    %64 = tpu.matmul %62, %63, %cst_36 {dimension_numbers = #tpu.dot_dimension_numbers<[1], [0], [0], [1], [0, 0, 1, 1], [], []>} : vector<16x128xbf16>, vector<128x128xbf16>, vector<16x128xf32> -> vector<16x128xf32>
    %c0_37 = arith.constant 0 : index
    %c0_38 = arith.constant 0 : index
    %65 = vector.load %arg9[%c0_37, %c0_38] : memref<1x128xf32, #tpu.memory_space<vmem>>, vector<1x128xf32>
    %66 = vector.broadcast %65 : vector<1x128xf32> to vector<16x128xf32>
    %67 = arith.addf %64, %66 : vector<16x128xf32>
    %c0_39 = arith.constant 0 : index
    %c0_40 = arith.constant 0 : index
    %c0_41 = arith.constant 0 : index
    %68 = vector.load %arg2[%c0_39, %c0_40, %c0_41] : memref<1x16x128xf32, #tpu.memory_space<vmem>>, vector<1x16x128xf32>
    %69 = vector.shape_cast %68 : vector<1x16x128xf32> to vector<16x128xf32>
    %c0_42 = arith.constant 0 : index
    %c0_43 = arith.constant 0 : index
    %70 = vector.load %arg10[%c0_42, %c0_43] : memref<1x128xf32, #tpu.memory_space<vmem>>, vector<1x128xf32>
    %71 = vector.broadcast %70 : vector<1x128xf32> to vector<16x128xf32>
    %72 = arith.mulf %67, %71 : vector<16x128xf32>
    %73 = arith.addf %72, %69 : vector<16x128xf32>
    %c0_44 = arith.constant 0 : index
    %c0_45 = arith.constant 0 : index
    %74 = vector.load %arg11[%c0_44, %c0_45] : memref<1x128xf32, #tpu.memory_space<vmem>>, vector<1x128xf32>
    %c0_46 = arith.constant 0 : index
    %c0_47 = arith.constant 0 : index
    %75 = vector.load %arg12[%c0_46, %c0_47] : memref<1x128xf32, #tpu.memory_space<vmem>>, vector<1x128xf32>
    %cst_48 = arith.constant dense<0.000000e+00> : vector<16xf32>
    %76 = vector.multi_reduction <add>, %73, %cst_48 [1] : vector<16x128xf32> to vector<16xf32>
    %77 = vector.shape_cast %76 : vector<16xf32> to vector<16x1xf32>
    %cst_49 = arith.constant 1.280000e+02 : f32
    %78 = vector.broadcast %cst_49 : f32 to vector<16x1xf32>
    %79 = arith.divf %77, %78 : vector<16x1xf32>
    %80 = vector.broadcast %79 : vector<16x1xf32> to vector<16x128xf32>
    %81 = arith.subf %73, %80 : vector<16x128xf32>
    %82 = arith.mulf %81, %81 : vector<16x128xf32>
    %cst_50 = arith.constant dense<0.000000e+00> : vector<16xf32>
    %83 = vector.multi_reduction <add>, %82, %cst_50 [1] : vector<16x128xf32> to vector<16xf32>
    %84 = vector.shape_cast %83 : vector<16xf32> to vector<16x1xf32>
    %cst_51 = arith.constant 1.280000e+02 : f32
    %85 = vector.broadcast %cst_51 : f32 to vector<16x1xf32>
    %86 = arith.divf %84, %85 : vector<16x1xf32>
    %87 = vector.broadcast %79 : vector<16x1xf32> to vector<16x128xf32>
    %88 = arith.subf %73, %87 : vector<16x128xf32>
    %cst_52 = arith.constant 1.000000e-03 : f32
    %89 = vector.broadcast %cst_52 : f32 to vector<16x1xf32>
    %90 = arith.addf %86, %89 : vector<16x1xf32>
    %91 = math.rsqrt %90 : vector<16x1xf32>
    %92 = vector.broadcast %91 : vector<16x1xf32> to vector<16x128xf32>
    %93 = arith.mulf %88, %92 : vector<16x128xf32>
    %94 = vector.broadcast %74 : vector<1x128xf32> to vector<16x128xf32>
    %95 = arith.mulf %93, %94 : vector<16x128xf32>
    %96 = vector.broadcast %75 : vector<1x128xf32> to vector<16x128xf32>
    %97 = arith.addf %95, %96 : vector<16x128xf32>
    %98 = arith.truncf %97 : vector<16x128xf32> to vector<16x128xbf16>
    %cst_53 = arith.constant 0.000000e+00 : f32
    %99 = vector.broadcast %cst_53 : f32 to vector<16x128xf32>
    %c0_54 = arith.constant 0 : index
    %c0_55 = arith.constant 0 : index
    %100 = vector.load %arg13[%c0_54, %c0_55] : memref<128x256xbf16, #tpu.memory_space<vmem>>, vector<128x256xbf16>
    %cst_56 = arith.constant dense<0.000000e+00> : vector<16x256xf32>
    %101 = tpu.matmul %98, %100, %cst_56 {dimension_numbers = #tpu.dot_dimension_numbers<[1], [0], [0], [1], [0, 0, 1, 1], [], []>} : vector<16x128xbf16>, vector<128x256xbf16>, vector<16x256xf32> -> vector<16x256xf32>
    %c0_57 = arith.constant 0 : index
    %c0_58 = arith.constant 0 : index
    %102 = vector.load %arg14[%c0_57, %c0_58] : memref<1x256xf32, #tpu.memory_space<vmem>>, vector<1x256xf32>
    %103 = vector.broadcast %102 : vector<1x256xf32> to vector<16x256xf32>
    %104 = arith.addf %101, %103 : vector<16x256xf32>
    %cst_59 = arith.constant 5.000000e-01 : f32
    %105 = vector.broadcast %cst_59 : f32 to vector<16x256xf32>
    %106 = arith.mulf %105, %104 : vector<16x256xf32>
    %cst_60 = arith.constant 1.41421354 : f32
    %107 = vector.broadcast %cst_60 : f32 to vector<16x256xf32>
    %108 = arith.divf %104, %107 : vector<16x256xf32>
    %109 = math.erf %108 : vector<16x256xf32>
    %cst_61 = arith.constant 1.000000e+00 : f32
    %110 = vector.broadcast %cst_61 : f32 to vector<16x256xf32>
    %111 = arith.addf %110, %109 : vector<16x256xf32>
    %112 = arith.mulf %106, %111 : vector<16x256xf32>
    %113 = arith.truncf %112 : vector<16x256xf32> to vector<16x256xbf16>
    %c0_62 = arith.constant 0 : index
    %c0_63 = arith.constant 0 : index
    %114 = vector.load %arg15[%c0_62, %c0_63] : memref<256x128xbf16, #tpu.memory_space<vmem>>, vector<256x128xbf16>
    %cst_64 = arith.constant dense<0.000000e+00> : vector<16x128xf32>
    %115 = tpu.matmul %113, %114, %cst_64 {dimension_numbers = #tpu.dot_dimension_numbers<[1], [0], [0], [1], [0, 0, 1, 1], [], []>} : vector<16x256xbf16>, vector<256x128xbf16>, vector<16x128xf32> -> vector<16x128xf32>
    %116 = arith.addf %99, %115 : vector<16x128xf32>
    %c0_65 = arith.constant 0 : index
    %c0_66 = arith.constant 0 : index
    %117 = vector.load %arg16[%c0_65, %c0_66] : memref<1x128xf32, #tpu.memory_space<vmem>>, vector<1x128xf32>
    %118 = vector.broadcast %117 : vector<1x128xf32> to vector<16x128xf32>
    %119 = arith.addf %116, %118 : vector<16x128xf32>
    %c0_67 = arith.constant 0 : index
    %c0_68 = arith.constant 0 : index
    %120 = vector.load %arg17[%c0_67, %c0_68] : memref<1x128xf32, #tpu.memory_space<vmem>>, vector<1x128xf32>
    %121 = vector.broadcast %120 : vector<1x128xf32> to vector<16x128xf32>
    %122 = arith.mulf %119, %121 : vector<16x128xf32>
    %123 = arith.addf %122, %73 : vector<16x128xf32>
    %c0_69 = arith.constant 0 : index
    %c0_70 = arith.constant 0 : index
    %c0_71 = arith.constant 0 : index
    %124 = vector.load %arg18[%c0_69, %c0_70, %c0_71] : memref<1x16x128xf32, #tpu.memory_space<vmem>>, vector<1x16x128xf32>
    %125 = vector.shape_cast %124 : vector<1x16x128xf32> to vector<16x128xf32>
    %126 = vector.shape_cast %123 : vector<16x128xf32> to vector<1x16x128xf32>
    tpu.vector_store %arg18[%c0_69, %c0_70, %c0_71], %126 {strides = array<i32>} : memref<1x16x128xf32, #tpu.memory_space<vmem>>, vector<1x16x128xf32>,
    return
  }
  func.func @transform_0(%arg0: i32, %arg1: i32) -> (i32, i32, i32) {
    %c0_i32 = arith.constant 0 : i32
    %c0_i32_0 = arith.constant 0 : i32
    return %arg0, %arg1, %c0_i32 : i32, i32, i32
  }
  func.func @transform_1(%arg0: i32, %arg1: i32) -> (i32, i32, i32) {
    %c0_i32 = arith.constant 0 : i32
    %c0_i32_0 = arith.constant 0 : i32
    %c0_i32_1 = arith.constant 0 : i32
    return %arg0, %c0_i32, %c0_i32_0 : i32, i32, i32
  }
  func.func @transform_2(%arg0: i32, %arg1: i32) -> (i32, i32) {
    %c0_i32 = arith.constant 0 : i32
    %c0_i32_0 = arith.constant 0 : i32
    %c0_i32_1 = arith.constant 0 : i32
    return %c0_i32, %c0_i32_0 : i32, i32
  }
  func.func @transform_3(%arg0: i32, %arg1: i32) -> (i32, i32) {
    %c0_i32 = arith.constant 0 : i32
    %c0_i32_0 = arith.constant 0 : i32
    %c0_i32_1 = arith.constant 0 : i32
    return %c0_i32, %c0_i32_0 : i32, i32
  }
  func.func @transform_4(%arg0: i32, %arg1: i32) -> (i32, i32) {
    %c0_i32 = arith.constant 0 : i32
    %c0_i32_0 = arith.constant 0 : i32
    %c0_i32_1 = arith.constant 0 : i32
    return %c0_i32, %c0_i32_0 : i32, i32
  }
  func.func @transform_5(%arg0: i32, %arg1: i32) -> (i32, i32) {
    %c0_i32 = arith.constant 0 : i32
    %c0_i32_0 = arith.constant 0 : i32
    %c0_i32_1 = arith.constant 0 : i32
    return %c0_i32, %c0_i32_0 : i32, i32
  }
  func.func @transform_6(%arg0: i32, %arg1: i32) -> (i32, i32) {
    %c0_i32 = arith.constant 0 : i32
    %c0_i32_0 = arith.constant 0 : i32
    %c0_i32_1 = arith.constant 0 : i32
    return %c0_i32, %c0_i32_0 : i32, i32
  }
  func.func @transform_7(%arg0: i32, %arg1: i32) -> (i32, i32) {
    %c0_i32 = arith.constant 0 : i32
    %c0_i32_0 = arith.constant 0 : i32
    %c0_i32_1 = arith.constant 0 : i32
    return %c0_i32, %c0_i32_0 : i32, i32
  }
  func.func @transform_8(%arg0: i32, %arg1: i32) -> (i32, i32) {
    %c0_i32 = arith.constant 0 : i32
    %c0_i32_0 = arith.constant 0 : i32
    %c0_i32_1 = arith.constant 0 : i32
    return %c0_i32, %c0_i32_0 : i32, i32
  }
  func.func @transform_9(%arg0: i32, %arg1: i32) -> (i32, i32) {
    %c0_i32 = arith.constant 0 : i32
    %c0_i32_0 = arith.constant 0 : i32
    %c0_i32_1 = arith.constant 0 : i32
    return %c0_i32, %c0_i32_0 : i32, i32
  }
  func.func @transform_10(%arg0: i32, %arg1: i32) -> (i32, i32) {
    %c0_i32 = arith.constant 0 : i32
    %c0_i32_0 = arith.constant 0 : i32
    %c0_i32_1 = arith.constant 0 : i32
    return %c0_i32, %c0_i32_0 : i32, i32
  }
  func.func @transform_11(%arg0: i32, %arg1: i32) -> (i32, i32) {
    %c0_i32 = arith.constant 0 : i32
    %c0_i32_0 = arith.constant 0 : i32
    %c0_i32_1 = arith.constant 0 : i32
    return %c0_i32, %c0_i32_0 : i32, i32
  }
  func.func @transform_12(%arg0: i32, %arg1: i32) -> (i32, i32) {
    %c0_i32 = arith.constant 0 : i32
    %c0_i32_0 = arith.constant 0 : i32
    %c0_i32_1 = arith.constant 0 : i32
    return %c0_i32, %c0_i32_0 : i32, i32
  }
  func.func @transform_13(%arg0: i32, %arg1: i32) -> (i32, i32) {
    %c0_i32 = arith.constant 0 : i32
    %c0_i32_0 = arith.constant 0 : i32
    %c0_i32_1 = arith.constant 0 : i32
    return %c0_i32, %c0_i32_0 : i32, i32
  }
  func.func @transform_14(%arg0: i32, %arg1: i32) -> (i32, i32) {
    %c0_i32 = arith.constant 0 : i32
    %c0_i32_0 = arith.constant 0 : i32
    %c0_i32_1 = arith.constant 0 : i32
    return %c0_i32, %c0_i32_0 : i32, i32
  }
  func.func @transform_15(%arg0: i32, %arg1: i32) -> (i32, i32) {
    %c0_i32 = arith.constant 0 : i32
    %c0_i32_0 = arith.constant 0 : i32
    %c0_i32_1 = arith.constant 0 : i32
    return %c0_i32, %c0_i32_0 : i32, i32
  }
  func.func @transform_16(%arg0: i32, %arg1: i32) -> (i32, i32, i32) {
    %c0_i32 = arith.constant 0 : i32
    %c0_i32_0 = arith.constant 0 : i32
    return %arg0, %arg1, %c0_i32 : i32, i32, i32
  }
}

</mosaic_0001>

<bundles_post_ra>
// kernel: tpu_custom_call.1
= control target key start
LH: loop header
LB: loop body
LE: loop exit
PB: predicated region body
PF: predicated region fallthrough
CT: control target
= control target key end

     0   :  { %s3667_s0 = inlined_call_operand.hbm [shape: f32[2,16,128], index: 0, kind: input, shape index: {}]   ;;  %s3668_s1 = inlined_call_operand.hbm [shape: f32[2,16,128], index: 1, kind: input, shape index: {}]   ;;  %s3669_s2 = inlined_call_operand.vmem [shape: f32[1,128], index: 2, kind: input, shape index: {}]   ;;  %s3670_s3 = inlined_call_operand.vmem [shape: f32[1,128], index: 3, kind: input, shape index: {}]   ;;  %s3671_s4 = inlined_call_operand.hbm [shape: bf16[128,384], index: 4, kind: input, shape index: {}]   ;;  %s3672_s5 = inlined_call_operand.vmem [shape: f32[1,384], index: 5, kind: input, shape index: {}]   ;;  %s3673_s6 = inlined_call_operand.hbm [shape: bf16[128,128], index: 6, kind: input, shape index: {}]   ;;  %s3674_s7 = inlined_call_operand.vmem [shape: f32[1,128], index: 7, kind: input, shape index: {}]   ;;  %s3675_s8 = inlined_call_operand.vmem [shape: f32[1,128], index: 8, kind: input, shape index: {}]   ;;  %s3676_s9 = inlined_call_operand.vmem [shape: f32[1,128], index: 9, kind: input, shape index: {}]   ;;  %s3677_s10 = inlined_call_operand.vmem [shape: f32[1,128], index: 10, kind: input, shape index: {}]   ;;  %s3678_s11 = inlined_call_operand.hbm [shape: bf16[128,256], index: 11, kind: input, shape index: {}]   ;;  %s3679_s12 = inlined_call_operand.vmem [shape: f32[1,256], index: 12, kind: input, shape index: {}]   ;;  %s3680_s13 = inlined_call_operand.hbm [shape: bf16[256,128], index: 13, kind: input, shape index: {}]   ;;  %s3681_s14 = inlined_call_operand.vmem [shape: f32[1,128], index: 14, kind: input, shape index: {}]   ;;  %s3682_s15 = inlined_call_operand.vmem [shape: f32[1,128], index: 15, kind: input, shape index: {}]   ;;  %s3683_s16 = inlined_call_operand.hbm [shape: f32[2,16,128], index: 16, kind: output, shape index: {}]  }
   0x1   :  { %3700 = sst [smem:[#allocation30_spill]] %s3667_s0 }
   0x2   :  { %3701 = sst [smem:[#allocation31_spill]] %s3671_s4 }
   0x3   :  { %3702 = sst [smem:[#allocation32_spill]] %s3673_s6 }
   0x4   :  { %3703 = sst [smem:[#allocation33_spill]] %s3675_s8 }
   0x5   :  { %3704 = sst [smem:[#allocation34_spill]] %s3676_s9 }
   0x6   :  { %3705 = sst [smem:[#allocation35_spill]] %s3677_s10 }
   0x7   :  { %3706 = sst [smem:[#allocation36_spill]] %s3678_s11 }
   0x8   :  { %3707 = sst [smem:[#allocation37_spill]] %s3679_s12 }
   0x9   :  { %3708 = sst [smem:[#allocation38_spill]] %s3680_s13 }
   0xa   :  { %3709 = sst [smem:[#allocation39_spill]] %s3681_s14 }
   0xb   :  { %3710 = sst [smem:[#allocation40_spill]] %s3682_s15 }
   0xc   :  { %3711 = sst [smem:[#allocation41_spill]] %s3683_s16 }
   0xd   :  { %21 = vsyncpa [#allocation8], 0 }
   0xe   :  { %23 = vsyncpa [#allocation8 + $0x1], 0 }
   0xf   :  { %24 = vsyncpa [#allocation11], 0 }
  0x10   :  { %26 = vsyncpa [#allocation11 + $0x1], 0 }
  0x11   :  { %27 = vsyncpa [#allocation14], 0 }
  0x12   :  { %28 = vsyncpa [#allocation17], 0 }
  0x13   :  { %29 = vsyncpa [#allocation9], 0 }
  0x14   :  { %31 = vsyncpa [#allocation9 + $0x1], 0  ;;  %s3119_s21 = smov 0   ;;  %s3121_s22 = smov 0  }
  0x15   :  { %s3123_s23 = smov 0   ;;  %s3125_s24 = smov 0  }
  0x16   :  { %s3127_s25 = smov 0   ;;  %s3129_s26 = smov 0  }
  0x17 LB: > { %3712 = sst [smem:[#allocation25_spill]] %s2991_s21  ;;  %s3150_s27 = sadd.s32 4294967295, %s3011_s26   ;;  %s3011_s26 = sphi %s3129_s26, %s37_s26   ;;  %s3007_s25 = sphi %s3127_s25, %s3755_s25   ;;  %s3003_s24 = sphi %s3125_s24, %s3754_s24   ;;  %s2999_s23 = sphi %s3123_s23, %s3758_s23   ;;  %s2995_s22 = sphi %s3121_s22, %s3757_s22   ;;  %s2991_s21 = sphi %s3119_s21, %s3756_s21  }
  0x18   : > { %3713 = sst [smem:[#allocation26_spill]] %s3003_s24  ;;  %s2237_s28 = sadd.s32 4294967294, %s3011_s26  }
  0x19   : > { %3714 = sst [smem:[#allocation27_spill]] %s3007_s25  ;;  %p71_p0 = scmp.ne.s32.totalorder %s2995_s22, %s2991_s21 }
  0x1a   : > { %p3688_p1 = scmp.eq.s32.totalorder %s3150_s27, 0  ;;  %p423_p3 = scmp.eq.s32.totalorder %s2237_s28, 1 }
  0x1b   : > { %p2238_p5 = scmp.ge.s32.totalorder %s3011_s26, 1  ;;  %p430_p7 = scmp.lt.s32.totalorder %s3011_s26, 3 }
  0x1c   : > { %p3159_p4 = por %p3688_p1, %p71_p0  ;;  %p3164_p6 = por %p423_p3, %p71_p0 }
  0x1d   : > { %p3169_p8 = pnand %p2238_p5, %p430_p7  ;;  %s3013_s17 = smov [#allocation12]  }
  0x1e   : > { %s3715_s29 = scalar_select %p3159_p4, 1, 0 }
  0x1f   : > { %s3716_s30 = scalar_select %p3164_p6, 1, 0 }
  0x20   : > { %s3718_s0 = scalar_select %p3169_p8, 1, 0 }
  0x21   : > { %3717 = sst [smem:[#allocation28_spill]] %s3716_s30  ;;  %s448_s18 = sshll.u32 %s3013_s17, 4  ;;  %s3173_s18 = int_to_ptr.vmem [resolvable:$true] %s448_s18 }
  0x22   : > { %p2513_p9 = pneg %p3169_p8  ;;  %s3014_s20 = smov [#allocation13]  }
  0x23   : > { %s464_s28 = sshll.u32 %s3014_s20, 4  ;;  %s3720_s4 = sld [smem:[#allocation31_spill]]  ;;  %s3184_s28 = int_to_ptr.vmem [resolvable:$true] %s464_s28 }
  0x24   : > { %p3180_p11 = pnand %p2513_p9, %p3688_p1 }
  0x26   : > { %p3194_p13 = pneg %p3180_p11 }
  0x29   : > { %s2741_s16 = scalar_lea.hbm %s3720_s4, 3072 }
  0x2a   : > { %p2742_p12 = scmp.ne.s32.totalorder %s3720_s4, %s2741_s16  ;;  %p2748_p5 = scmp.lt.u32.totalorder %s2741_s16, %s3720_s4 }
  0x2c   : > { %p2744_p0 = pnand %p3194_p13, %p2742_p12 }
  0x2e   : > { %p2745_p3 = pneg %p2744_p0 }
  0x30   : > { %p2750_p7 = pnand %p2748_p5, %p2745_p3 }
  0x32   : > { %2753 = shalt.err (!%p2750_p7)
}
  0x33   : > { %s2754_s15 = scalar_lea.vmem %s3173_s18, 3072  ;;  %p2762_p2 = scmp.lt.s32.totalorder %s3173_s18, %s3173_s18 }
  0x34   : > { %p2755_p9 = scmp.ne.s32.totalorder %s3173_s18, %s2754_s15  ;;  %p2763_p6 = scmp.lt.s32.totalorder %s2754_s15, %s2754_s15 }
  0x36   : > { %p2757_p10 = pnand %p2755_p9, %p3194_p13  ;;  %p2764_p12 = por %p2763_p6, %p2762_p2 }
  0x38   : > { %p2758_p1 = pneg %p2757_p10 }
  0x3a   : > { %p2765_p0 = pnand %p2764_p12, %p2758_p1 }
  0x3c   : > { %2768 = shalt.err (!%p2765_p0)
}
  0x3d   : > { %s3015_s21 = smov 192   ;;  %s3016_s16 = smov 12  }
  0x3e   : > { %2516 = dma.hbm_to_vmem [thread:$0]  (!%p3180_p11), %s3720_s4, 3072, %s3173_s18, [#allocation11], %s3015_s21, %s3015_s21, %s3016_s16  }
  0x3f   : > { %s3722_s6 = sld [smem:[#allocation32_spill]] }
  0x45   : > { %s2769_s12 = scalar_lea.hbm %s3722_s6, 1024 }
  0x46   : > { %p2770_p2 = scmp.ne.s32.totalorder %s3722_s6, %s2769_s12  ;;  %p2776_p10 = scmp.lt.u32.totalorder %s2769_s12, %s3722_s6 }
  0x48   : > { %p2772_p1 = pnand %p2770_p2, %p3194_p13 }
  0x4a   : > { %p2773_p6 = pneg %p2772_p1 }
  0x4c   : > { %p2778_p3 = pnand %p2776_p10, %p2773_p6 }
  0x4e   : > { %2781 = shalt.err (!%p2778_p3)
}
  0x4f   : > { %s2782_s18 = scalar_lea.vmem %s3184_s28, 1024  ;;  %p2790_p12 = scmp.lt.s32.totalorder %s3184_s28, %s3184_s28 }
  0x50   : > { %p2783_p5 = scmp.ne.s32.totalorder %s3184_s28, %s2782_s18  ;;  %p2791_p0 = scmp.lt.s32.totalorder %s2782_s18, %s2782_s18 }
  0x52   : > { %p2785_p7 = pnand %p2783_p5, %p3194_p13  ;;  %p2792_p2 = por %p2791_p0, %p2790_p12 }
  0x54   : > { %p2786_p9 = pneg %p2785_p7 }
  0x56   : > { %p2793_p1 = pnand %p2792_p2, %p2786_p9 }
  0x58   : > { %2796 = shalt.err (!%p2793_p1)
}
  0x59   : > { %s3691_s9 = smov 64   ;;  %s3692_s8 = smov 4  }
  0x5a   : > { %2519 = dma.hbm_to_vmem [thread:$0]  (!%p3180_p11), %s3722_s6, 1024, %s3184_s28, [#allocation14], %s3691_s9, %s3691_s9, %s3692_s8  }
  0x5b   : > { %s3019_s21 = smov [#allocation15]   ;;  %s3723_s11 = sld [smem:[#allocation36_spill]] }
  0x5c   : > { %s489_s16 = sshll.u32 %s3019_s21, 4  ;;  %s490_s16 = int_to_ptr.vmem [resolvable:$true] %s489_s16 }
  0x61   : > { %s2797_s17 = scalar_lea.hbm %s3723_s11, 2048 }
  0x62   : > { %p2798_p6 = scmp.ne.s32.totalorder %s3723_s11, %s2797_s17  ;;  %p2804_p5 = scmp.lt.u32.totalorder %s2797_s17, %s3723_s11 }
  0x64   : > { %p2800_p10 = pnand %p2798_p6, %p3194_p13 }
  0x66   : > { %p2801_p3 = pneg %p2800_p10 }
  0x68   : > { %p2806_p7 = pnand %p2804_p5, %p2801_p3 }
  0x6a   : > { %2809 = shalt.err (!%p2806_p7)
}
  0x6b   : > { %s2810_s28 = scalar_lea.vmem %s490_s16, 2048  ;;  %p2818_p2 = scmp.lt.s32.totalorder %s490_s16, %s490_s16 }
  0x6c   : > { %p2811_p9 = scmp.ne.s32.totalorder %s490_s16, %s2810_s28  ;;  %p2819_p1 = scmp.lt.s32.totalorder %s2810_s28, %s2810_s28 }
  0x6e   : > { %p2813_p12 = pnand %p2811_p9, %p3194_p13  ;;  %p2820_p4 = por %p2819_p1, %p2818_p2 }
  0x70   : > { %p2814_p0 = pneg %p2813_p12 }
  0x72   : > { %p2821_p8 = pnand %p2820_p4, %p2814_p0 }
  0x74   : > { %2824 = shalt.err (!%p2821_p8)
}
  0x75   : > { %s3693_s10 = smov 128   ;;  %s3695_s12 = smov 8  }
  0x76   : > { %2522 = dma.hbm_to_vmem [thread:$0]  (!%p3180_p11), %s3723_s11, 2048, %s490_s16, [#allocation14], %s3693_s10, %s3693_s10, %s3695_s12  }
  0x77   : > { %s3022_s24 = smov [#allocation16]   ;;  %s3724_s13 = sld [smem:[#allocation38_spill]] }
  0x78   : > { %s505_s30 = sshll.u32 %s3022_s24, 4  ;;  %s506_s30 = int_to_ptr.vmem [resolvable:$true] %s505_s30 }
  0x7d   : > { %s2825_s15 = scalar_lea.hbm %s3724_s13, 2048 }
  0x7e   : > { %p2826_p4 = scmp.ne.s32.totalorder %s3724_s13, %s2825_s15  ;;  %p2832_p10 = scmp.lt.u32.totalorder %s2825_s15, %s3724_s13 }
  0x80   : > { %p2828_p8 = pnand %p2826_p4, %p3194_p13 }
  0x82   : > { %p2829_p6 = pneg %p2828_p8 }
  0x84   : > { %p2834_p3 = pnand %p2832_p10, %p2829_p6 }
  0x86   : > { %2837 = shalt.err (!%p2834_p3)
}
  0x87   : > { %s2838_s16 = scalar_lea.vmem %s506_s30, 2048  ;;  %p2846_p12 = scmp.lt.s32.totalorder %s506_s30, %s506_s30 }
  0x88   : > { %p2839_p5 = scmp.ne.s32.totalorder %s506_s30, %s2838_s16  ;;  %p2847_p0 = scmp.lt.s32.totalorder %s2838_s16, %s2838_s16 }
  0x8a   : > { %p2841_p7 = pnand %p2839_p5, %p3194_p13  ;;  %p2848_p2 = por %p2847_p0, %p2846_p12 }
  0x8c   : > { %p2842_p9 = pneg %p2841_p7 }
  0x8e   : > { %p2849_p1 = pnand %p2848_p2, %p2842_p9 }
  0x90   : > { %2852 = shalt.err (!%p2849_p1)
}
  0x91   : > { %s3725_s4 = smov 4   ;;  %s3726_s21 = smov 64  }
  0x92   : > { %2525 = dma.hbm_to_vmem [thread:$0]  (!%p3180_p11), %s3724_s13, 2048, %s506_s30, [#allocation17], %s3726_s21, %s3726_s21, %s3725_s4  }
  0x93   : > { %s49_s14 = sadd.s32 1, %s3007_s25  ;;  %s58_s19 = sadd.s32 1, %s2999_s23 }
  0x94   : > { %p51_p13 = scmp.ge.s32.totalorder %s49_s14, 2  ;;  %p65_p4 = scmp.ne.s32.totalorder %s2999_s23, %s2995_s22 }
  0x95   : > { %p66_p8 = scmp.eq.s32.totalorder %s3011_s26, 0  ;;  %p2541_p6 = scmp.lt.s32.totalorder %s3011_s26, 2 }
  0x96   : > { %s3760_s14 = smov (%p51_p13, %s49_s14), 0  ;;  %p3728_p3 = scmp.eq.s32.totalorder %s3150_s27, 1 }
  0x97   : > { %3727 = sst [smem:[#allocation29_spill]] %s3760_s14  ;;  %p67_p10 = por %p66_p8, %p65_p4 }
  0x98   : > { %p3293_p5 = por %p3728_p3, %p65_p4  ;;  %s53_s17 = ssub.s32 %s3007_s25, %s3760_s14 }
  0x99   : > { %s525_s20 = sand.u32 1, %s2999_s23   ;;  %p56_p7 = scmp.eq.s32.totalorder %s53_s17, 0 }
  0x9a   : > { %s3300_s30 = sshll.u32 %s525_s20, 4  ;;  %s2344_s15 = sshll.u32 %s3007_s25, 8 }
  0x9b   : > { %s3304_s18 = scalar_select %p56_p7, %s2999_s23, %s58_s19  }
  0x9c   : > { %s3730_s4 = sld [smem:[#allocation30_spill]]  ;;  %s529_s9 = scalar_lea.vmem [#allocation7], %s3300_s30 }
  0x9d   : > { %s538_s8 = sshll.u32 %s529_s9, 4  ;;  %p3314_p11 = pnand %p2541_p6, %p67_p10  ;;  %s3318_s8 = int_to_ptr.vmem [resolvable:$true] %s538_s8 }
  0x9e   : > { %s3323_s28 = scalar_lea.hbm %s3668_s1, %s2344_s15  ;;  %s3325_s16 = scalar_lea.sflag [#allocation8], %s525_s20 }
  0x9f   : > { %p2855_p12 = pneg %p3314_p11 }
  0xa2   : > { %s3309_s21 = scalar_lea.hbm %s3730_s4, %s2344_s15  ;;  %s2858_s11 = scalar_lea.hbm %s3730_s4, 512 }
  0xa3   : > { %s2853_s12 = scalar_lea.hbm %s3309_s21, 256  ;;  %p2859_p1 = scmp.lt.u32.totalorder %s3309_s21, %s3730_s4 }
  0xa4   : > { %p2854_p9 = scmp.ne.s32.totalorder %s3309_s21, %s2853_s12  ;;  %p2860_p13 = scmp.lt.u32.totalorder %s2858_s11, %s2853_s12 }
  0xa5   : > { %p2862_p8 = scmp.lt.u32.totalorder %s2853_s12, %s3309_s21 }
  0xa6   : > { %p2856_p0 = pnand %p2855_p12, %p2854_p9  ;;  %p2861_p4 = por %p2860_p13, %p2859_p1 }
  0xa8   : > { %p2857_p2 = pneg %p2856_p0  ;;  %p2863_p6 = por %p2862_p8, %p2861_p4 }
  0xaa   : > { %p2864_p10 = pnand %p2863_p6, %p2857_p2 }
  0xac   : > { %2867 = shalt.err (!%p2864_p10)
}
  0xad   : > { %s2868_s10 = scalar_lea.vmem %s3318_s8, 256  ;;  %s3023_s6 = smov [#allocation7]  }
  0xae   : > { %p2869_p3 = scmp.ne.s32.totalorder %s3318_s8, %s2868_s10  ;;  %s2873_s20 = sshll.u32 %s3023_s6, 4  ;;  %s2874_s20 = int_to_ptr.vmem [resolvable:$false] %s2873_s20 }
  0xaf   : > { %s2875_s13 = scalar_lea.vmem %s2874_s20, 512  ;;  %p2876_p0 = scmp.lt.s32.totalorder %s3318_s8, %s2874_s20 }
  0xb0   : > { %p2871_p7 = pnand %p2869_p3, %p2855_p12  ;;  %p2877_p1 = scmp.lt.s32.totalorder %s2875_s13, %s2868_s10 }
  0xb2   : > { %p2872_p9 = pneg %p2871_p7  ;;  %p2878_p13 = por %p2877_p1, %p2876_p0 }
  0xb4   : > { %p2879_p4 = pnand %p2878_p13, %p2872_p9 }
  0xb6   : > { %2882 = shalt.err (!%p2879_p4)
}
  0xb7   : > { %s3732_s11 = smov 8   ;;  %s3733_s12 = smov 128  }
  0xb8   : > { %2529 = dma.hbm_to_vmem [thread:$0]  (!%p3314_p11), %s3309_s21, 256, %s3318_s8, %s3325_s16, %s3733_s12, %s3733_s12, %s3732_s11  }
  0xb9   : > { %s552_s14 = scalar_lea.vmem [#allocation10], %s3300_s30  ;;  %s548_s19 = sand.u32 1, %s3011_s26  }
  0xba   : > { %s559_s15 = sshll.u32 %s552_s14, 4  ;;  %s3360_s9 = scalar_lea.sflag [#allocation11], %s548_s19  ;;  %s3358_s15 = int_to_ptr.vmem [resolvable:$true] %s559_s15 }
  0xbb   : > { %s2883_s10 = scalar_lea.hbm %s3323_s28, 256  ;;  %s2888_s13 = scalar_lea.hbm %s3668_s1, 512 }
  0xbc   : > { %p2884_p2 = scmp.ne.s32.totalorder %s3323_s28, %s2883_s10  ;;  %p2889_p10 = scmp.lt.u32.totalorder %s3323_s28, %s3668_s1 }
  0xbd   : > { %p2890_p3 = scmp.lt.u32.totalorder %s2888_s13, %s2883_s10  ;;  %p2892_p9 = scmp.lt.u32.totalorder %s2883_s10, %s3323_s28 }
  0xbe   : > { %p2886_p8 = pnand %p2884_p2, %p2855_p12 }
  0xbf   : > { %p2891_p7 = por %p2890_p3, %p2889_p10 }
  0xc0   : > { %p2887_p6 = pneg %p2886_p8 }
  0xc1   : > { %p2893_p0 = por %p2892_p9, %p2891_p7 }
  0xc3   : > { %p2894_p1 = pnand %p2893_p0, %p2887_p6 }
  0xc5   : > { %2897 = shalt.err (!%p2894_p1)
}
  0xc6   : > { %s2898_s30 = scalar_lea.vmem %s3358_s15, 256  ;;  %s3024_s21 = smov [#allocation10]  }
  0xc7   : > { %p2899_p13 = scmp.ne.s32.totalorder %s3358_s15, %s2898_s30  ;;  %s2903_s8 = sshll.u32 %s3024_s21, 4  ;;  %s2904_s8 = int_to_ptr.vmem [resolvable:$false] %s2903_s8 }
  0xc8   : > { %s2905_s25 = scalar_lea.vmem %s2904_s8, 512  ;;  %p2906_p8 = scmp.lt.s32.totalorder %s3358_s15, %s2904_s8 }
  0xc9   : > { %p2901_p4 = pnand %p2899_p13, %p2855_p12  ;;  %p2907_p10 = scmp.lt.s32.totalorder %s2905_s25, %s2898_s30 }
  0xcb   : > { %p2902_p2 = pneg %p2901_p4  ;;  %p2908_p3 = por %p2907_p10, %p2906_p8 }
  0xcd   : > { %p2909_p7 = pnand %p2908_p3, %p2902_p2 }
  0xcf   : > { %2912 = shalt.err (!%p2909_p7)
}
  0xd0   : > { %2532 = dma.hbm_to_vmem [thread:$0]  (!%p3314_p11), %s3323_s28, 256, %s3358_s15, %s3360_s9, %s3733_s12, %s3733_s12, %s3732_s11  }
  0xd1   : > { %p3734_p12 = scmp.ne.s32.totalorder %s3718_s0, 0 }
  0xd2   : > { %s3392_s4 = sand.u32 (!%p3734_p12), 1, %s2995_s22   ;;  %p3735_p6 = scmp.ne.s32.totalorder (!%p3734_p12), %s3715_s29, 0 }
  0xd3   : > { %571 = sbr.rel (%p3734_p12) target bundleno = 2839 (0xb17), region = 84  ;;  %s3395_s16 = sshll.u32 (!%p3734_p12), %s3392_s4, 4 }
  0xd4   : > { %s574_s17 = scalar_lea.sflag (!%p3734_p12), [#allocation8], %s3392_s4  ;;  %s577_s14 = scalar_lea.vmem (!%p3734_p12), [#allocation7], %s3395_s16 }
  0xda   : > { %2966 = dma.done.wait (%p3735_p6), %s574_s17, 256  }
  0xdb   : > { %2968 = vsyncadd (%p3735_p6), %s574_s17, 4294967040  ;;  %s582_s0 = sand.u32 1, %s3150_s27   ;;  %s586_s11 = scalar_lea.vmem [#allocation10], %s3395_s16 }
  0xdc   : > { %s583_s28 = scalar_lea.sflag [#allocation11], %s582_s0 }
  0xdd   : > { %2970 = dma.done.wait (%p3735_p6), %s583_s28, 256  }
  0xde   : > { %2972 = vsyncadd (%p3735_p6), %s583_s28, 4294967040  ;;  %p3736_p11 = scmp.eq.s32.totalorder %s3150_s27, 0 }
  0xe0   : > { %2974 = dma.done.wait (%p3736_p11), [#allocation11], 3072   ;;  %p3737_p9 = pmov %p3736_p11 }
  0xe2   : > { %2976 = vsyncadd (%p3737_p9), [#allocation11], 4294964224  ;;  %p3738_p0 = pmov %p3737_p9 }
  0xe4   : > { %2978 = dma.done.wait (%p3738_p0), [#allocation14], 3072   ;;  %p3739_p1 = pmov %p3738_p0 }
  0xe5   : > { %p3740_p13 = pmov %p3738_p0 }
  0xe6   : > { %2980 = vsyncadd (%p3739_p1), [#allocation14], 4294964224 }
  0xe7   : > { %2982 = dma.done.wait (%p3740_p13), [#allocation17], 2048   ;;  %p3741_p4 = pmov %p3738_p0 }
  0xe8   : > { %v663_v0 = vld [vmem:[%s586_s11] sm:$0xff]  ;;  %v664_v1 = vld [vmem:[%s586_s11 + $0x8] sm:$0xff]  ;;  %v3025_v4 = vmov 0.0   ;;  %v3026_v30 = vmov 0   ;;  %vm3027_vm0 = vmmov 0   ;;  %v727_v53 = vlaneseq  ;;  %s3028_s20 = smov 64  }
  0xe9   : > { %2984 = vsyncadd (%p3741_p4), [#allocation17], 4294965248  ;;  %667 = vadd.xlane.f32.xlu0 %v663_v0  ;;  %v2613_v2 = vld [vmem:[#allocation12 + $0x8] ss:$12 sps:$4 sm:$0xff]   ;;  %v2615_v3 = vld [vmem:[#allocation12 + $0x4] ss:$12 sps:$4 sm:$0xff]   ;;  %2403 = vmatprep.subr.bf16.mxu1 %v3025_v4 }
  0xea   : > { %v2616_v5 = vld [vmem:[#allocation12] ss:$12 sps:$4 sm:$0xff]   ;;  %817 = vmatprep.subr.bf16.mxu0 %v2613_v2  ;;  %v2619_v15 = vld [vmem:[#allocation12 + $0x1c] ss:$12 sps:$4 sm:$0xff]   ;;  %v2620_v16 = vld [vmem:[#allocation12 + $0x18] ss:$12 sps:$4 sm:$0xff]   ;;  %849 = vmatprep.mubr.bf16.mxu0 %v3026_v30 }
  0xeb   : > { %v2617_v6 = vld [vmem:[#allocation12 + $0x20] ss:$12 sps:$4 sm:$0xff]   ;;  %818 = vmatpush1.bf16.msra.mxu0 %v2615_v3  ;;  %2404 = vmatpush3.bf16.msra.mxu1 %v2616_v5  ;;  %v2621_v17 = vld [vmem:[#allocation12 + $0x38] ss:$12 sps:$4 sm:$0xff]   ;;  %v2624_v19 = vld [vmem:[#allocation12 + $0x30] ss:$12 sps:$4 sm:$0xff]  }
  0xec   : > { %819 = vmatprep.subr.bf16.mxu0 %v2617_v6  ;;  %2405 = vmatprep.subr.bf16.mxu1 %v3025_v4  ;;  %v2623_v18 = vld [vmem:[#allocation12 + $0x34] ss:$12 sps:$4 sm:$0xff]   ;;  %v2625_v20 = vld [vmem:[#allocation12 + $0x50] ss:$12 sps:$4 sm:$0xff]   ;;  %v2627_v21 = vld [vmem:[#allocation12 + $0x4c] ss:$12 sps:$4 sm:$0xff]  }
  0xed   : > { %669 = vadd.xlane.f32.xlu0 %v664_v1  ;;  %v2628_v22 = vld [vmem:[#allocation12 + $0x48] ss:$12 sps:$4 sm:$0xff]   ;;  %v2631_v24 = vld [vmem:[#allocation12 + $0x64] ss:$12 sps:$4 sm:$0xff]   ;;  %v2632_v25 = vld [vmem:[#allocation12 + $0x60] ss:$12 sps:$4 sm:$0xff]   ;;  %2419 = vmatprep.mubr.msk.bf16.mxu1 %vm3027_vm0, %v3025_v4 }
  0xee   : > { %v2629_v23 = vld [vmem:[#allocation12 + $0x68] ss:$12 sps:$4 sm:$0xff]   ;;  %v2633_v26 = vld [vmem:[#allocation12 + $0x80] ss:$12 sps:$4 sm:$0xff]   ;;  %v2636_v28 = vld [vmem:[#allocation12 + $0x78] ss:$12 sps:$4 sm:$0xff]  }
  0xef   : > { %820 = vmatpush1.bf16.msra.mxu0 %v2619_v15  ;;  %2406 = vmatpush3.bf16.msra.mxu1 %v2620_v16  ;;  %v2635_v27 = vld [vmem:[#allocation12 + $0x7c] ss:$12 sps:$4 sm:$0xff]   ;;  %v2637_v29 = vld [vmem:[#allocation12 + $0x98] ss:$12 sps:$4 sm:$0xff]   ;;  %v2639_v31 = vld [vmem:[#allocation12 + $0x94] ss:$12 sps:$4 sm:$0xff]  }
  0xf0   : > { %2407 = vmatprep.subr.bf16.mxu1 %v3025_v4  ;;  %821 = vmatprep.subr.bf16.mxu0 %v2621_v17  ;;  %v2640_v32 = vld [vmem:[#allocation12 + $0x90] ss:$12 sps:$4 sm:$0xff]   ;;  %v2643_v34 = vld [vmem:[#allocation12 + $0xac] ss:$12 sps:$4 sm:$0xff]   ;;  %v2644_v35 = vld [vmem:[#allocation12 + $0xa8] ss:$12 sps:$4 sm:$0xff]  }
  0xf1   : > { %v2641_v33 = vld [vmem:[#allocation12 + $0xb0] ss:$12 sps:$4 sm:$0xff]   ;;  %v3454_v54 = vshrl.u32 %v727_v53, 7  ;;  %vm861_vm1 = vcmask 261120   ;;  %s3029_s13 = smov 96   ;;  %s3030_s30 = smov 32  }
  0xf2   : > { %v2258_v44 = vld [vmem:[%s3669_s2] ss:$0 sm:$0xff]  ;;  %v725_v56 = vld [vmem:[%s3672_s5 + $0x1] sm:$0x3]  ;;  %vm1233_vm2 = vcmask 130048   ;;  %vm1512_vm3 = vcmask 523520  }
  0xf3   : > { %822 = vmatpush1.bf16.msra.mxu0 %v2623_v18  ;;  %2408 = vmatpush3.bf16.msra.mxu1 %v2624_v19  ;;  %v2259_v48 = vld [vmem:[%s3670_s3] ss:$0 sm:$0xff]  ;;  %v729_v55 = vsub.s32 0, %v3454_v54  ;;  %v733_v57 = vsub.s32 1, %v3454_v54  ;;  %vm1523_vm4 = vcmask 785920   ;;  %vm1534_vm5 = vcmask 1048320  }
  0xf4   : > { %2409 = vmatprep.subr.bf16.mxu1 %v3025_v4  ;;  %823 = vmatprep.subr.bf16.mxu0 %v2625_v20  ;;  %v2276_v60 = vld [vmem:[%s3672_s5] ss:$0 sm:$0xff]  ;;  %s3742_s0 = sld [smem:[#allocation33_spill]]  ;;  %s3743_s11 = sld [smem:[#allocation34_spill]] }
  0xf5   : > { %v730_v58 = vrot.slane %v725_v56, %v729_v55  ;;  %v734_v62 = vrot.slane %v725_v56, %v733_v57  ;;  %s3744_s12 = sld [smem:[#allocation35_spill]]  ;;  %s3745_s9 = sld [smem:[#allocation37_spill]] }
  0xf6   : > { %s3746_s10 = sld [smem:[#allocation26_spill]]  ;;  %s3748_s8 = sld [smem:[#allocation40_spill]] }
  0xf7   : > { %824 = vmatpush1.bf16.msra.mxu0 %v2627_v21  ;;  %2410 = vmatpush3.bf16.msra.mxu1 %v2628_v22  ;;  %s655_s25 = scalar_lea.vmem [#allocation18], %s3395_s16  ;;  %s2071_s16 = scalar_lea.sflag [#allocation9], %s3392_s4 }
  0xf8   : > { %2411 = vmatprep.subr.bf16.mxu1 %v3025_v4  ;;  %825 = vmatprep.subr.bf16.mxu0 %v2629_v23  ;;  %s2086_s17 = sshll.u32 %s655_s25, 4  ;;  %s3617_s17 = int_to_ptr.vmem [resolvable:$true] %s2086_s17 }
  0xf9   : > { %s2913_s29 = scalar_lea.vmem %s3617_s17, 256 }
  0xfa   : > { %p2914_p2 = scmp.ne.s32.totalorder %s3617_s17, %s2913_s29 }
  0xfb   : > { %826 = vmatpush1.bf16.msra.mxu0 %v2631_v24  ;;  %2412 = vmatpush3.bf16.msra.mxu1 %v2632_v25 }
  0xfc   : > { %827 = vmatprep.subr.bf16.mxu0 %v2633_v26  ;;  %2413 = vmatprep.subr.bf16.mxu1 %v3025_v4  ;;  %p2915_p8 = pnand %p2914_p2, %p3293_p5 }
  0xfe   : > { %p2916_p10 = pneg %p2915_p8 }
  0xff   : > { %828 = vmatpush1.bf16.msra.mxu0 %v2635_v27  ;;  %2414 = vmatpush3.bf16.msra.mxu1 %v2636_v28 }
 0x100   : > { %829 = vmatprep.subr.bf16.mxu0 %v2637_v29  ;;  %2415 = vmatprep.subr.bf16.mxu1 %v3025_v4 }
 0x103   : > { %830 = vmatpush1.bf16.msra.mxu0 %v2639_v31  ;;  %2416 = vmatpush3.bf16.msra.mxu1 %v2640_v32 }
 0x104   : > { %831 = vmatprep.subr.bf16.mxu0 %v2641_v33  ;;  %2417 = vmatprep.subr.bf16.mxu1 %v3025_v4 }
 0x107   : > { %832 = vmatpush1.bf16.msra.mxu0 %v2643_v34  ;;  %2418 = vmatpush3.bf16.msra.mxu1 %v2644_v35 }
 0x108   : > { %2423 = vmatprep.subr.bf16.mxu1 %v3025_v4  ;;  %2447 = vmatprep.subr.bf16.mxu0 %v3025_v4 }
 0x176   : > { %v668_v7 = vpop.xlane.xlu0 %667 }
 0x177   : > { %v672_v8 = vmul.f32 0.0078125, %v668_v7 }
 0x179   : > { %v3423_v9 = vsub.f32 %v663_v0, %v672_v8 }
 0x17a   : > { %v670_v10 = vpop.xlane.xlu0 %669 }
 0x17b   : > { %v673_v11 = vmul.f32 0.0078125, %v670_v10  ;;  %v676_v12 = vmul.f32 %v3423_v9, %v3423_v9 }
 0x17d   : > { %v3427_v13 = vsub.f32 %v664_v1, %v673_v11  ;;  %678 = vadd.xlane.f32.xlu1 %v676_v12 }
 0x17f   : > { %v677_v14 = vmul.f32 %v3427_v13, %v3427_v13 }
 0x181   : > { %680 = vadd.xlane.f32.xlu1 %v677_v14 }
 0x20a   : > { %v679_v36 = vpop.xlane.xlu1 %678 }
 0x20b   : > { %v682_v37 = vmul.f32 0.0078125, %v679_v36 }
 0x20d   : > { %v684_v38 = vadd.f32 0.001, %v682_v37 }
 0x20e   : > { %v681_v39 = vpop.xlane.xlu1 %680 }
 0x20f   : > { %2693 = vrsqrt.f32 %v684_v38  ;;  %v683_v40 = vmul.f32 0.0078125, %v681_v39 }
 0x211   : > { %v685_v41 = vadd.f32 0.001, %v683_v40 }
 0x213   : > { %2695 = vrsqrt.f32 %v685_v41 }
 0x219   : > { %v2694_v42 = vpop.eup %2693 }
 0x21a   : > { %v688_v43 = vmul.f32 %v2694_v42, %v3423_v9 }
 0x21c   : > { %v696_v47 = vmul.f32 %v2258_v44, %v688_v43 }
 0x21d   : > { %v2696_v45 = vpop.eup %2695 }
 0x21e   : > { %v689_v46 = vmul.f32 %v2696_v45, %v3427_v13  ;;  %v704_v50 = vadd.f32 %v2259_v48, %v696_v47 }
 0x220   : > { %v697_v49 = vmul.f32 %v2258_v44, %v689_v46 }
 0x222   : > { %v705_v51 = vadd.f32 %v2259_v48, %v697_v49 }
 0x224   : > { %v708_v52 = vpack.c.bf16 %v705_v51, %v704_v50 }
 0x226   : > { %850 = vmatmul.mubr.bf16.vlgmr.msra.gmra.mrb[0].mxu0 %v708_v52  ;;  %2420 = vmatmul.mubr.bf16.vlgmr.msra.gmra.mrb[0].mxu1 %v708_v52 }
 0x227   : > { %2425 = vmatprep.mubr.msk.bf16.mxu1 %vm3027_vm0, %v3025_v4  ;;  %2449 = vmatprep.mubr.msk.bf16.mxu0 %vm3027_vm0, %v3025_v4 }
 0x2f9   : > { %v851_v59 = vpop.f32.mrb[0].mxu0  ;;  %v1007_v61 = vpop.f32.mrb[0].mxu1 }
 0x2fa   : > { %v853_v63 = vpop.f32.mrb[1].mxu0  ;;  %v2421_v0 = vpop.f32.mrb[1].mxu1  ;;  %v852_v3 = vadd.f32 %v851_v59, %v730_v58  ;;  %v1008_v5 = vadd.f32 %v2276_v60, %v1007_v61 }
 0x2fb   : > { %v855_v1 = vpop.f32.mrb[2].mxu0  ;;  %v1010_v2 = vpop.f32.mrb[2].mxu1  ;;  %v854_v10 = vadd.f32 %v853_v63, %v734_v62 }
 0x2fc   : > { %v856_v6 = vadd.f32 %v855_v1, %v730_v58  ;;  %v1011_v7 = vadd.f32 %v2276_v60, %v1010_v2  ;;  %v857_v8 = vpop.f32.mrb[3].mxu0  ;;  %v2422_v9 = vpop.f32.mrb[3].mxu1 }
 0x2fd   : > { %v858_v11 = vadd.f32 %v857_v8, %v734_v62 }
 0x2fe   : > { %v860_v12 = vpack.c.bf16 %v856_v6, %v852_v3  ;;  %v1014_v13 = vpack.c.bf16 %v1011_v7, %v1008_v5 }
 0x2ff   : > { %v3468_v14 = vpack.c.bf16 %v858_v11, %v854_v10 }
 0x300   : > { %862 = vst.msk [vmem:[#allocation4] sm:$0xff] %vm861_vm1, %v860_v12  ;;  %1016 = vst.msk [vmem:[#allocation3] sm:$0xff] %vm861_vm1, %v1014_v13  ;;  %877 = vrot.lane.b32.xlu1 %v860_v12, %s3028_s20  ;;  %866 = vrot.lane.b32.xlu0 %v860_v12, %s3029_s13 }
 0x301   : > { %864 = vst.msk [vmem:[#allocation5] sm:$0xff] %vm861_vm1, %v3468_v14 }
 0x304   : > { %1018 = vrot.lane.b32.xlu1 %v1014_v13, %s3029_s13  ;;  %1023 = vrot.lane.b32.xlu0 %v1014_v13, %s3028_s20 }
 0x307   : > { %v1037_v15 = vld [vmem:[#allocation4] sm:$0xff] }
 0x308   : > { %887 = vrot.lane.b32.xlu1 %v860_v12, %s3030_s30  ;;  %v1049_v16 = vsel %vm861_vm1, %v1037_v15, 0  ;;  %v1041_v17 = vld [vmem:[#allocation5] sm:$0xff] }
 0x309   : > { %2424 = vmatpush3.bf16.xpose.msra.mxu1 %v1049_v16  ;;  %2448 = vmatpush3.bf16.msra.mxu0 %v1041_v17  ;;  %v1033_v18 = vld [vmem:[#allocation3] sm:$0xff] }
 0x30a   : > { %2429 = vmatprep.subr.bf16.mxu1 %v3025_v4  ;;  %2459 = vmatprep.subr.bf16.mxu0 %v3025_v4 }
 0x30c   : > { %1028 = vrot.lane.b32.xlu1 %v1014_v13, %s3030_s30 }
 0x310   : > { %2426 = vmatmul.mubr.msk.bf16.vlgmr.msra.gmra.mrb[4].mxu1 %vm861_vm1, %v1033_v18 }
 0x311   : > { %2431 = vmatprep.mubr.msk.bf16.mxu1 %vm3027_vm0, %v3025_v4 }
 0x372   : > { %v878_v19 = vpop.permute.xlu1 %877  ;;  %v867_v20 = vpop.permute.xlu0 %866 }
 0x373   : > { %881 = vst.msk [vmem:[#allocation4 + $0x10] sm:$0xff] %vm861_vm1, %v878_v19  ;;  %870 = vst.msk [vmem:[#allocation4 + $0x8] sm:$0xff] %vm861_vm1, %v867_v20 }
 0x376   : > { %v1019_v21 = vpop.permute.xlu1 %1018  ;;  %v1024_v22 = vpop.permute.xlu0 %1023 }
 0x377   : > { %1022 = vst.msk [vmem:[#allocation3 + $0x8] sm:$0xff] %vm861_vm1, %v1019_v21  ;;  %1027 = vst.msk [vmem:[#allocation3 + $0x10] sm:$0xff] %vm861_vm1, %v1024_v22 }
 0x37a   : > { %v888_v23 = vpop.permute.xlu1 %887  ;;  %v1038_v24 = vld [vmem:[#allocation4 + $0x8] sm:$0xff]  ;;  %v1039_v27 = vld [vmem:[#allocation4 + $0x10] sm:$0xff] }
 0x37b   : > { %891 = vst.msk [vmem:[#allocation4 + $0x18] sm:$0xff] %vm861_vm1, %v888_v23  ;;  %v1096_v25 = vsel %vm861_vm1, %v1038_v24, 0  ;;  %v1143_v29 = vsel %vm861_vm1, %v1039_v27, 0 }
 0x37c   : > { %2430 = vmatpush3.bf16.xpose.msra.mxu1 %v1096_v25 }
 0x37d   : > { %2435 = vmatprep.subr.bf16.mxu1 %v3025_v4 }
 0x37e   : > { %v1029_v26 = vpop.permute.xlu1 %1028  ;;  %v1034_v28 = vld [vmem:[#allocation3 + $0x8] sm:$0xff]  ;;  %v1035_v32 = vld [vmem:[#allocation3 + $0x10] sm:$0xff] }
 0x37f   : > { %1032 = vst.msk [vmem:[#allocation3 + $0x18] sm:$0xff] %vm861_vm1, %v1029_v26 }
 0x382   : > { %v1040_v31 = vld [vmem:[#allocation4 + $0x18] sm:$0xff] }
 0x383   : > { %2432 = vmatmul.mubr.msk.bf16.vlgmr.msra.gmra.mrb[8].mxu1 %vm861_vm1, %v1034_v28  ;;  %v1190_v33 = vsel %vm861_vm1, %v1040_v31, 0 }
 0x384   : > { %2436 = vmatpush3.bf16.xpose.msra.mxu1 %v1143_v29  ;;  %2437 = vmatprep.mubr.msk.bf16.mxu1 %vm3027_vm0, %v3025_v4 }
 0x385   : > { %2441 = vmatprep.subr.bf16.mxu1 %v3025_v4 }
 0x386   : > { %v1036_v34 = vld [vmem:[#allocation3 + $0x18] sm:$0xff] }
 0x38b   : > { %2438 = vmatmul.mubr.msk.bf16.vlgmr.msra.gmra.mrb[12].mxu1 %vm861_vm1, %v1035_v32 }
 0x38c   : > { %2442 = vmatpush3.bf16.xpose.msra.mxu1 %v1190_v33  ;;  %2443 = vmatprep.mubr.msk.bf16.mxu1 %vm3027_vm0, %v3025_v4 }
 0x38d   : > { %2453 = vmatprep.subr.bf16.mxu1 %v3025_v4 }
 0x393   : > { %2444 = vmatmul.mubr.msk.bf16.vlgmr.msra.gmra.mrb[16].mxu1 %vm861_vm1, %v1036_v34 }
 0x394   : > { %2455 = vmatprep.mubr.msk.bf16.mxu1 %vm3027_vm0, %v3025_v4 }
 0x3e3   : > { %v1085_v35 = vpop.f32.mrb[4].mxu1 }
 0x3e4   : > { %v2427_v36 = vpop.f32.mrb[5].mxu1  ;;  %v1234_v37 = vsel %vm1233_vm2, %v1085_v35, -inf }
 0x3e5   : > { %1235 = vmax.xlane.f32.xlu0 %v1234_v37  ;;  %v1088_v38 = vpop.f32.mrb[6].mxu1 }
 0x3e6   : > { %v2428_v39 = vpop.f32.mrb[7].mxu1  ;;  %v1237_v40 = vsel %vm1233_vm2, %v1088_v38, -inf }
 0x3e7   : > { %1238 = vmax.xlane.f32.xlu1 %v1237_v40 }
 0x456   : > { %v1132_v41 = vpop.f32.mrb[8].mxu1 }
 0x457   : > { %v2433_v42 = vpop.f32.mrb[9].mxu1  ;;  %v1240_v43 = vsel %vm1233_vm2, %v1132_v41, -inf }
 0x458   : > { %1241 = vmax.xlane.f32.xlu0 %v1240_v43  ;;  %v1135_v44 = vpop.f32.mrb[10].mxu1 }
 0x459   : > { %v2434_v45 = vpop.f32.mrb[11].mxu1  ;;  %v1243_v46 = vsel %vm1233_vm2, %v1135_v44, -inf }
 0x45c   : > { %1244 = vmax.xlane.f32.xlu0 %v1243_v46 }
 0x45e   : > { %v1179_v47 = vpop.f32.mrb[12].mxu1 }
 0x45f   : > { %v2439_v48 = vpop.f32.mrb[13].mxu1  ;;  %v1246_v49 = vsel %vm1233_vm2, %v1179_v47, -inf }
 0x460   : > { %1247 = vmax.xlane.f32.xlu0 %v1246_v49  ;;  %v1182_v50 = vpop.f32.mrb[14].mxu1 }
 0x461   : > { %v2440_v51 = vpop.f32.mrb[15].mxu1  ;;  %v1249_v52 = vsel %vm1233_vm2, %v1182_v50, -inf }
 0x462   : > { %1250 = vmax.xlane.f32.xlu1 %v1249_v52 }
 0x466   : > { %v1226_v53 = vpop.f32.mrb[16].mxu1 }
 0x467   : > { %v2445_v56 = vpop.f32.mrb[17].mxu1  ;;  %v1252_v58 = vsel %vm1233_vm2, %v1226_v53, -inf }
 0x468   : > { %1253 = vmax.xlane.f32.xlu0 %v1252_v58  ;;  %v3514_v59 = vpop.f32.mrb[18].mxu1 }
 0x469   : > { %v2446_v60 = vpop.f32.mrb[19].mxu1  ;;  %v1255_v61 = vsel %vm1233_vm2, %v3514_v59, -inf }
 0x46a   : > { %1256 = vmax.xlane.f32.xlu1 %v1255_v61 }
 0x472   : > { %v1236_v62 = vpop.xlane.xlu0 %1235 }
 0x473   : > { %v1258_v63 = vsub.f32 %v1085_v35, %v1236_v62 }
 0x474   : > { %v1239_v0 = vpop.xlane.xlu1 %1238 }
 0x475   : > { %v1266_v1 = vmul.f32 1.442695, %v1258_v63  ;;  %v1259_v2 = vsub.f32 %v1088_v38, %v1239_v0 }
 0x477   : > { %2697 = vpow2.f32 %v1266_v1  ;;  %v1268_v3 = vmul.f32 1.442695, %v1259_v2 }
 0x479   : > { %2699 = vpow2.f32 %v1268_v3 }
 0x481   : > { %v2698_v5 = vpop.eup %2697 }
 0x482   : > { %v1282_v6 = vsel %vm1233_vm2, %v2698_v5, 0.0 }
 0x483   : > { %v2700_v7 = vpop.eup %2699  ;;  %1283 = vadd.xlane.f32.xlu0 %v1282_v6 }
 0x484   : > { %v1285_v8 = vsel %vm1233_vm2, %v2700_v7, 0.0 }
 0x485   : > { %1286 = vadd.xlane.f32.xlu1 %v1285_v8 }
 0x4e5   : > { %v1242_v9 = vpop.xlane.xlu0 %1241 }
 0x4e6   : > { %v1260_v10 = vsub.f32 %v1132_v41, %v1242_v9 }
 0x4e8   : > { %v1270_v11 = vmul.f32 1.442695, %v1260_v10 }
 0x4e9   : > { %v1245_v12 = vpop.xlane.xlu0 %1244 }
 0x4ea   : > { %2701 = vpow2.f32 %v1270_v11  ;;  %v1261_v13 = vsub.f32 %v1135_v44, %v1245_v12 }
 0x4ec   : > { %v1272_v15 = vmul.f32 1.442695, %v1261_v13 }
 0x4ed   : > { %v1248_v16 = vpop.xlane.xlu0 %1247 }
 0x4ee   : > { %2703 = vpow2.f32 %v1272_v15  ;;  %v1262_v17 = vsub.f32 %v1179_v47, %v1248_v16 }
 0x4ef   : > { %v1251_v18 = vpop.xlane.xlu1 %1250 }
 0x4f0   : > { %v1274_v19 = vmul.f32 1.442695, %v1262_v17  ;;  %v1263_v20 = vsub.f32 %v1182_v50, %v1251_v18 }
 0x4f2   : > { %2705 = vpow2.f32 %v1274_v19  ;;  %v1276_v21 = vmul.f32 1.442695, %v1263_v20  ;;  %v2645_v20 = vld [vmem:[#allocation13] sm:$0xff]  }
 0x4f4   : > { %v3520_v22 = vpop.eup %2701  ;;  %2707 = vpow2.f32 %v1276_v21 }
 0x4f5   : > { %v1254_v23 = vpop.xlane.xlu0 %1253  ;;  %v1288_v24 = vsel %vm1233_vm2, %v3520_v22, 0.0 }
 0x4f6   : > { %v1264_v25 = vsub.f32 %v1226_v53, %v1254_v23  ;;  %1289 = vadd.xlane.f32.xlu0 %v1288_v24  ;;  %v2646_v23 = vld [vmem:[#allocation13 + $0x8] sm:$0xff]  }
 0x4f7   : > { %v1257_v36 = vpop.xlane.xlu1 %1256 }
 0x4f8   : > { %v2704_v26 = vpop.eup %2703  ;;  %v1278_v27 = vmul.f32 1.442695, %v1264_v25  ;;  %v1265_v43 = vsub.f32 %v3514_v59, %v1257_v36 }
 0x4f9   : > { %v1291_v28 = vsel %vm1233_vm2, %v2704_v26, 0.0 }
 0x4fa   : > { %2709 = vpow2.f32 %v1278_v27  ;;  %1292 = vadd.xlane.f32.xlu1 %v1291_v28  ;;  %v1280_v45 = vmul.f32 1.442695, %v1265_v43 }
 0x4fc   : > { %v2706_v29 = vpop.eup %2705 }
 0x4fd   : > { %v1294_v31 = vsel %vm1233_vm2, %v2706_v29, 0.0 }
 0x4fe   : > { %v2708_v32 = vpop.eup %2707  ;;  %1295 = vadd.xlane.f32.xlu0 %v1294_v31  ;;  %v2649_v31 = vld [vmem:[#allocation13 + $0x20] sm:$0xff]  }
 0x4ff   : > { %v1297_v33 = vsel %vm1233_vm2, %v2708_v32, 0.0 }
 0x500   : > { %1298 = vadd.xlane.f32.xlu1 %v1297_v33  ;;  %v2651_v33 = vld [vmem:[#allocation13 + $0x30] sm:$0xff]  }
 0x504   : > { %v3527_v34 = vpop.eup %2709 }
 0x505   : > { %v1300_v35 = vsel %vm1233_vm2, %v3527_v34, 0.0 }
 0x506   : > { %1301 = vadd.xlane.f32.xlu0 %v1300_v35 }
 0x510   : > { %v1284_v37 = vpop.xlane.xlu0 %1283 }
 0x511   : > { %2711 = vrcp.f32 %v1284_v37  ;;  %882 = vrot.lane.b32.xlu1 %v3468_v14, %s3028_s20 }
 0x512   : > { %v1287_v38 = vpop.xlane.xlu1 %1286 }
 0x513   : > { %2713 = vrcp.f32 %v1287_v38 }
 0x514   : > { %2715 = vpow2.f32 %v1280_v45 }
 0x51b   : > { %v2712_v39 = vpop.eup %2711 }
 0x51c   : > { %872 = vrot.lane.b32.xlu0 %v3468_v14, %s3029_s13  ;;  %v1314_v41 = vmul.f32 %v2712_v39, %v2698_v5 }
 0x51d   : > { %v2714_v40 = vpop.eup %2713 }
 0x51e   : > { %v1315_v42 = vmul.f32 %v2714_v40, %v2700_v7  ;;  %v2716_v46 = vpop.eup %2715 }
 0x51f   : > { %v1303_v47 = vsel %vm1233_vm2, %v2716_v46, 0.0 }
 0x520   : > { %v1322_v44 = vpack.c.bf16 %v1315_v42, %v1314_v41 }
 0x522   : > { %2450 = vmatmul.mubr.msk.bf16.vlgmr.msra.gmra.mrb[4].mxu0 %vm1233_vm2, %v1322_v44 }
 0x523   : > { %2461 = vmatprep.mubr.msk.bf16.mxu0 %vm3027_vm0, %v3025_v4 }
 0x535   : > { %1304 = vadd.xlane.f32.xlu1 %v1303_v47  ;;  %v2293_v47 = vld [vmem:[%s3674_s7] ss:$0 sm:$0xff] }
 0x546   : > { %892 = vrot.lane.b32.xlu1 %v3468_v14, %s3030_s30 }
 0x583   : > { %v1290_v48 = vpop.xlane.xlu0 %1289 }
 0x587   : > { %v1293_v49 = vpop.xlane.xlu1 %1292 }
 0x58b   : > { %v1296_v50 = vpop.xlane.xlu0 %1295 }
 0x58c   : > { %2717 = vrcp.f32 %v1296_v50 }
 0x58d   : > { %v1299_v51 = vpop.xlane.xlu1 %1298 }
 0x58e   : > { %2719 = vrcp.f32 %v1299_v51 }
 0x58f   : > { %2721 = vrcp.f32 %v1293_v49  ;;  %v2302_v49 = vld [vmem:[%s3742_s0] ss:$0 sm:$0xff]  ;;  %s2346_s0 = sshll.u32 %s3746_s10, 8 }
 0x590   : > { %2723 = vrcp.f32 %v1290_v48 }
 0x591   : > { %v883_v52 = vpop.permute.xlu1 %882 }
 0x592   : > { %886 = vst.msk [vmem:[#allocation5 + $0x10] sm:$0xff] %vm861_vm1, %v883_v52 }
 0x593   : > { %v1302_v53 = vpop.xlane.xlu0 %1301 }
 0x594   : > { %2725 = vrcp.f32 %v1302_v53  ;;  %v1652_v53 = vld [vmem:[%s577_s14] sm:$0xff] }
 0x596   : > { %v2718_v56 = vpop.eup %2717 }
 0x597   : > { %v873_v58 = vpop.permute.xlu0 %872  ;;  %v1318_v60 = vmul.f32 %v2718_v56, %v2706_v29  ;;  %v2648_v29 = vld [vmem:[#allocation13 + $0x18] sm:$0xff]  }
 0x598   : > { %v2720_v59 = vpop.eup %2719  ;;  %876 = vst.msk [vmem:[#allocation5 + $0x8] sm:$0xff] %vm861_vm1, %v873_v58 }
 0x599   : > { %v1319_v61 = vmul.f32 %v2720_v59, %v2708_v32  ;;  %v1043_v14 = vld [vmem:[#allocation5 + $0x10] sm:$0xff]  ;;  %v2722_v62 = vpop.eup %2721  ;;  %v2650_v32 = vld [vmem:[#allocation13 + $0x28] sm:$0xff]  }
 0x59a   : > { %2460 = vmatpush3.bf16.msra.mxu0 %v1043_v14  ;;  %v2724_v0 = vpop.eup %2723  ;;  %v1317_v1 = vmul.f32 %v2722_v62, %v2704_v26 }
 0x59b   : > { %v1324_v63 = vpack.c.bf16 %v1319_v61, %v1318_v60  ;;  %2471 = vmatprep.subr.bf16.mxu0 %v3025_v4  ;;  %v1316_v2 = vmul.f32 %v2724_v0, %v3520_v22  ;;  %v1653_v60 = vld [vmem:[%s577_s14 + $0x8] sm:$0xff] }
 0x59c   : > { %v2655_v0 = vld [vmem:[#allocation15 + $0x4] ss:$8 sps:$4 sm:$0xff]  }
 0x59d   : > { %2462 = vmatmul.mubr.msk.bf16.vlgmr.msra.gmra.mrb[8].mxu0 %vm1233_vm2, %v1324_v63  ;;  %v1323_v5 = vpack.c.bf16 %v1317_v1, %v1316_v2  ;;  %v2653_v63 = vld [vmem:[#allocation15] ss:$8 sps:$4 sm:$0xff]   ;;  %v2658_v1 = vld [vmem:[#allocation15 + $0x14] ss:$8 sps:$4 sm:$0xff]   ;;  %v2656_v2 = vld [vmem:[#allocation15 + $0x10] ss:$8 sps:$4 sm:$0xff]  }
 0x59e   : > { %2487 = vmatprep.mubr.msk.bf16.mxu0 %vm3027_vm0, %v3025_v4  ;;  %v2726_v8 = vpop.eup %2725  ;;  %2472 = vmatpush3.bf16.msra.mxu0 %v2645_v20  ;;  %v2668_v20 = vld [vmem:[#allocation15 + $0x50] ss:$8 sps:$4 sm:$0xff]  }
 0x59f   : > { %v1042_v3 = vld [vmem:[#allocation5 + $0x8] sm:$0xff]  ;;  %v1320_v10 = vmul.f32 %v2726_v8, %v3527_v34  ;;  %2473 = vmatprep.subr.bf16.mxu0 %v3025_v4 }
 0x5a0   : > { %2454 = vmatpush3.bf16.msra.mxu1 %v1042_v3  ;;  %v2652_v34 = vld [vmem:[#allocation13 + $0x38] sm:$0xff]  }
 0x5a1   : > { %2465 = vmatprep.subr.bf16.mxu1 %v3025_v4 }
 0x5a2   : > { %2474 = vmatpush3.bf16.msra.mxu0 %v2646_v23  ;;  %v2676_v23 = vld [vmem:[#allocation15 + $0x74] ss:$8 sps:$4 sm:$0xff]  }
 0x5a3   : > { %2456 = vmatmul.mubr.msk.bf16.vlgmr.msra.gmra.mrb[20].mxu1 %vm1233_vm2, %v1323_v5  ;;  %2475 = vmatprep.subr.bf16.mxu0 %v3025_v4 }
 0x5a4   : > { %2467 = vmatprep.mubr.msk.bf16.mxu1 %vm3027_vm0, %v3025_v4 }
 0x5c2   : > { %v1305_v6 = vpop.xlane.xlu1 %1304 }
 0x5c3   : > { %2727 = vrcp.f32 %v1305_v6 }
 0x5c6   : > { %v893_v7 = vpop.permute.xlu1 %892 }
 0x5c7   : > { %896 = vst.msk [vmem:[#allocation5 + $0x18] sm:$0xff] %vm861_vm1, %v893_v7 }
 0x5cd   : > { %v2728_v9 = vpop.eup %2727 }
 0x5ce   : > { %v1321_v11 = vmul.f32 %v2728_v9, %v2716_v46  ;;  %v1044_v12 = vld [vmem:[#allocation5 + $0x18] sm:$0xff] }
 0x5cf   : > { %2466 = vmatpush3.bf16.msra.mxu1 %v1044_v12  ;;  %v2661_v12 = vld [vmem:[#allocation15 + $0x24] ss:$8 sps:$4 sm:$0xff]  }
 0x5d0   : > { %v1325_v13 = vpack.c.bf16 %v1321_v11, %v1320_v10  ;;  %1815 = vmatprep.subr.bf16.mxu1 %v2655_v0 }
 0x5d2   : > { %2468 = vmatmul.mubr.msk.bf16.vlgmr.msra.gmra.mrb[24].mxu1 %vm1233_vm2, %v1325_v13  ;;  %v2659_v13 = vld [vmem:[#allocation15 + $0x20] ss:$8 sps:$4 sm:$0xff]  }
 0x5d3   : > { %1847 = vmatprep.mubr.bf16.mxu1 %v3026_v30  ;;  %v2647_v30 = vld [vmem:[#allocation13 + $0x10] sm:$0xff]   ;;  %1816 = vmatpush1.bf16.msra.mxu1 %v2653_v63 }
 0x5d4   : > { %2476 = vmatpush3.bf16.msra.mxu0 %v2647_v30  ;;  %1817 = vmatprep.subr.bf16.mxu1 %v2658_v1  ;;  %v2678_v30 = vld [vmem:[#allocation16] sm:$0xff]  }
 0x5d5   : > { %2477 = vmatprep.subr.bf16.mxu0 %v3025_v4 }
 0x5d7   : > { %1818 = vmatpush1.bf16.msra.mxu1 %v2656_v2 }
 0x5d8   : > { %2478 = vmatpush3.bf16.msra.mxu0 %v2648_v29  ;;  %1819 = vmatprep.subr.bf16.mxu1 %v2661_v12 }
 0x5d9   : > { %2479 = vmatprep.subr.bf16.mxu0 %v3025_v4 }
 0x5db   : > { %1820 = vmatpush1.bf16.msra.mxu1 %v2659_v13 }
 0x5dc   : > { %2480 = vmatpush3.bf16.msra.mxu0 %v2649_v31 }
 0x5dd   : > { %2481 = vmatprep.subr.bf16.mxu0 %v3025_v4 }
 0x5e0   : > { %2482 = vmatpush3.bf16.msra.mxu0 %v2650_v32 }
 0x5e1   : > { %2483 = vmatprep.subr.bf16.mxu0 %v3025_v4 }
 0x5e4   : > { %2484 = vmatpush3.bf16.msra.mxu0 %v2651_v33 }
 0x5e5   : > { %2485 = vmatprep.subr.bf16.mxu0 %v3025_v4 }
 0x5e8   : > { %2486 = vmatpush3.bf16.msra.mxu0 %v2652_v34 }
 0x5f5   : > { %v1363_v15 = vpop.f32.mrb[4].mxu0 }
 0x5f6   : > { %1502 = vst.msk [vmem:[#allocation6] sm:$0xff] %vm861_vm1, %v1363_v15  ;;  %v2451_v16 = vpop.f32.mrb[5].mxu0  ;;  %v2664_v15 = vld [vmem:[#allocation15 + $0x34] ss:$8 sps:$4 sm:$0xff]  }
 0x5f7   : > { %v1366_v17 = vpop.f32.mrb[6].mxu0  ;;  %v2662_v16 = vld [vmem:[#allocation15 + $0x30] ss:$8 sps:$4 sm:$0xff]   ;;  %1821 = vmatprep.subr.bf16.mxu1 %v2664_v15 }
 0x5f8   : > { %1503 = vst.msk [vmem:[#allocation6 + $0x8] sm:$0xff] %vm861_vm1, %v1366_v17  ;;  %v2452_v18 = vpop.f32.mrb[7].mxu0  ;;  %1822 = vmatpush1.bf16.msra.mxu1 %v2662_v16  ;;  %v2667_v17 = vld [vmem:[#allocation15 + $0x44] ss:$8 sps:$4 sm:$0xff]  }
 0x5f9   : > { %v2665_v18 = vld [vmem:[#allocation15 + $0x40] ss:$8 sps:$4 sm:$0xff]   ;;  %1823 = vmatprep.subr.bf16.mxu1 %v2667_v17 }
 0x5fc   : > { %1824 = vmatpush1.bf16.msra.mxu1 %v2665_v18 }
 0x670   : > { %v1451_v19 = vpop.f32.mrb[8].mxu0 }
 0x671   : > { %v2463_v21 = vpop.f32.mrb[9].mxu0 }
 0x672   : > { %v1454_v22 = vpop.f32.mrb[10].mxu0  ;;  %v2673_v21 = vld [vmem:[#allocation15 + $0x64] ss:$8 sps:$4 sm:$0xff]  }
 0x673   : > { %v2464_v24 = vpop.f32.mrb[11].mxu0 }
 0x674   : > { %v2674_v24 = vld [vmem:[#allocation15 + $0x70] ss:$8 sps:$4 sm:$0xff]  }
 0x676   : > { %v1407_v25 = vpop.f32.mrb[20].mxu1 }
 0x677   : > { %1506 = vrot.lane.b32.xlu1 %v1407_v25, %s3030_s30  ;;  %v2457_v26 = vpop.f32.mrb[21].mxu1  ;;  %v2677_v25 = vld [vmem:[#allocation16 + $0x40] sm:$0xff]  }
 0x678   : > { %v1410_v27 = vpop.f32.mrb[22].mxu1  ;;  %v2679_v26 = vld [vmem:[#allocation16 + $0x48] sm:$0xff]   ;;  %2381 = vmatprep.subr.bf16.mxu0 %v2677_v25 }
 0x679   : > { %1508 = vrot.lane.b32.xlu0 %v1410_v27, %s3030_s30  ;;  %v2458_v28 = vpop.f32.mrb[23].mxu1  ;;  %v2680_v27 = vld [vmem:[#allocation16 + $0x8] sm:$0xff]  }
 0x67b   : > { %1517 = vrot.lane.b32.xlu1 %v1451_v19, %s3028_s20  ;;  %v2670_v19 = vld [vmem:[#allocation15 + $0x54] ss:$8 sps:$4 sm:$0xff]  }
 0x67c   : > { %1825 = vmatprep.subr.bf16.mxu1 %v2670_v19 }
 0x67d   : > { %1519 = vrot.lane.b32.xlu0 %v1454_v22, %s3028_s20  ;;  %1826 = vmatpush1.bf16.msra.mxu1 %v2668_v20  ;;  %v2671_v22 = vld [vmem:[#allocation15 + $0x60] ss:$8 sps:$4 sm:$0xff]  }
 0x67e   : > { %1827 = vmatprep.subr.bf16.mxu1 %v2673_v21 }
 0x681   : > { %1828 = vmatpush1.bf16.msra.mxu1 %v2671_v22 }
 0x682   : > { %1829 = vmatprep.subr.bf16.mxu1 %v2676_v23 }
 0x685   : > { %1830 = vmatpush1.bf16.msra.mxu1 %v2674_v24 }
 0x6a5   : > { %v1495_v35 = vpop.f32.mrb[24].mxu1 }
 0x6a6   : > { %1528 = vrot.lane.b32.xlu1 %v1495_v35, %s3029_s13  ;;  %v2469_v36 = vpop.f32.mrb[25].mxu1 }
 0x6a7   : > { %v1498_v37 = vpop.f32.mrb[26].mxu1 }
 0x6a8   : > { %1530 = vrot.lane.b32.xlu0 %v1498_v37, %s3029_s13  ;;  %v2470_v38 = vpop.f32.mrb[27].mxu1  ;;  %v2303_v37 = vld [vmem:[%s3743_s11] ss:$0 sm:$0xff]  ;;  %s3747_s13 = sld [smem:[#allocation39_spill]]  ;;  %s3749_s11 = sld [smem:[#allocation41_spill]] }
 0x6ae   : > { %s3615_s27 = scalar_lea.hbm %s3749_s11, %s2346_s0 }
 0x6e9   : > { %v1507_v39 = vpop.permute.xlu1 %1506 }
 0x6ea   : > { %1513 = vst.msk [vmem:[#allocation6] sm:$0xff] %vm1512_vm3, %v1507_v39 }
 0x6eb   : > { %v1509_v40 = vpop.permute.xlu0 %1508 }
 0x6ec   : > { %1514 = vst.msk [vmem:[#allocation6 + $0x8] sm:$0xff] %vm1512_vm3, %v1509_v40 }
 0x6ed   : > { %v1518_v41 = vpop.permute.xlu1 %1517 }
 0x6ee   : > { %1524 = vst.msk [vmem:[#allocation6] sm:$0xff] %vm1523_vm4, %v1518_v41  ;;  %v2304_v41 = vld [vmem:[%s3744_s12] ss:$0 sm:$0xff]  ;;  %s3031_s12 = smov [#allocation18]  }
 0x6ef   : > { %v1520_v42 = vpop.permute.xlu0 %1519  ;;  %s2917_s15 = sshll.u32 %s3031_s12, 4  ;;  %s2918_s15 = int_to_ptr.vmem [resolvable:$false] %s2917_s15 }
 0x6f0   : > { %1525 = vst.msk [vmem:[#allocation6 + $0x8] sm:$0xff] %vm1523_vm4, %v1520_v42  ;;  %s2919_s19 = scalar_lea.vmem %s2918_s15, 512  ;;  %p2920_p3 = scmp.lt.s32.totalorder %s3617_s17, %s2918_s15 }
 0x6f1   : > { %p2921_p7 = scmp.lt.s32.totalorder %s2919_s19, %s2913_s29 }
 0x6f3   : > { %p2922_p12 = por %p2921_p7, %p2920_p3 }
 0x6f5   : > { %p2923_p6 = pnand %p2922_p12, %p2916_p10 }
 0x718   : > { %v1529_v4 = vpop.permute.xlu1 %1528 }
 0x719   : > { %1535 = vst.msk [vmem:[#allocation6] sm:$0xff] %vm1534_vm5, %v1529_v4 }
 0x71a   : > { %v1531_v43 = vpop.permute.xlu0 %1530 }
 0x71b   : > { %1536 = vst.msk [vmem:[#allocation6 + $0x8] sm:$0xff] %vm1534_vm5, %v1531_v43 }
 0x720   : > { %v1537_v44 = vld [vmem:[#allocation6] sm:$0xff] }
 0x722   : > { %v1538_v45 = vld [vmem:[#allocation6 + $0x8] sm:$0xff] }
 0x723   : > { %v1539_v46 = vpack.c.bf16 %v1538_v45, %v1537_v44  ;;  %v2681_v45 = vld [vmem:[#allocation16 + $0x50] sm:$0xff]  }
 0x725   : > { %2488 = vmatmul.mubr.bf16.vlgmr.msra.gmra.mrb[12].mxu0 %v1539_v46  ;;  %v2682_v46 = vld [vmem:[#allocation16 + $0x10] sm:$0xff]  }
 0x726   : > { %2382 = vmatpush3.bf16.msra.mxu0 %v2678_v30 }
 0x727   : > { %2383 = vmatprep.subr.bf16.mxu0 %v2679_v26 }
 0x72a   : > { %2384 = vmatpush3.bf16.msra.mxu0 %v2680_v27 }
 0x72b   : > { %2385 = vmatprep.subr.bf16.mxu0 %v2681_v45 }
 0x72e   : > { %2386 = vmatpush3.bf16.msra.mxu0 %v2682_v46 }
 0x7f8   : > { %v1645_v48 = vpop.f32.mrb[12].mxu0 }
 0x7f9   : > { %v1646_v50 = vadd.f32 %v2293_v47, %v1645_v48  ;;  %v2489_v51 = vpop.f32.mrb[13].mxu0  ;;  %v2684_v48 = vld [vmem:[#allocation16 + $0x18] sm:$0xff]  }
 0x7fa   : > { %v1648_v52 = vpop.f32.mrb[14].mxu0  ;;  %v2687_v51 = vld [vmem:[#allocation16 + $0x68] sm:$0xff]  }
 0x7fb   : > { %v1661_v56 = vmul.f32 %v2302_v49, %v1646_v50  ;;  %v1649_v58 = vadd.f32 %v2293_v47, %v1648_v52  ;;  %v2490_v59 = vpop.f32.mrb[15].mxu0  ;;  %v2683_v47 = vld [vmem:[#allocation16 + $0x58] sm:$0xff]   ;;  %v2686_v50 = vld [vmem:[#allocation16 + $0x20] sm:$0xff]   ;;  %v2688_v52 = vld [vmem:[#allocation16 + $0x28] sm:$0xff]  }
 0x7fc   : > { %2387 = vmatprep.subr.bf16.mxu0 %v2683_v47  ;;  %v2692_v59 = vld [vmem:[#allocation16 + $0x38] sm:$0xff]  }
 0x7fd   : > { %v1662_v61 = vmul.f32 %v2302_v49, %v1649_v58  ;;  %v3582_v14 = vadd.f32 %v1661_v56, %v1652_v53  ;;  %2388 = vmatpush3.bf16.msra.mxu0 %v2684_v48  ;;  %v2685_v49 = vld [vmem:[#allocation16 + $0x60] sm:$0xff]   ;;  %v2689_v53 = vld [vmem:[#allocation16 + $0x70] sm:$0xff]   ;;  %v2691_v58 = vld [vmem:[#allocation16 + $0x78] sm:$0xff]  }
 0x7fe   : > { %2389 = vmatprep.subr.bf16.mxu0 %v2685_v49  ;;  %v2690_v56 = vld [vmem:[#allocation16 + $0x30] sm:$0xff]  }
 0x7ff   : > { %1667 = vadd.xlane.f32.xlu1 %v3582_v14  ;;  %v3585_v62 = vadd.f32 %v1662_v61, %v1653_v60  ;;  %v1723_v60 = vld [vmem:[%s3745_s9] sm:$0x3] }
 0x800   : > { %v1728_v61 = vrot.slane %v1723_v60, %v729_v55  ;;  %v1732_v63 = vrot.slane %v1723_v60, %v733_v57 }
 0x801   : > { %1669 = vadd.xlane.f32.xlu0 %v3585_v62  ;;  %2390 = vmatpush3.bf16.msra.mxu0 %v2686_v50 }
 0x802   : > { %2391 = vmatprep.subr.bf16.mxu0 %v2687_v51 }
 0x805   : > { %2392 = vmatpush3.bf16.msra.mxu0 %v2688_v52 }
 0x806   : > { %2393 = vmatprep.subr.bf16.mxu0 %v2689_v53 }
 0x809   : > { %2394 = vmatpush3.bf16.msra.mxu0 %v2690_v56 }
 0x80a   : > { %2395 = vmatprep.subr.bf16.mxu0 %v2691_v58 }
 0x80d   : > { %2396 = vmatpush3.bf16.msra.mxu0 %v2692_v59 }
 0x88c   : > { %v1668_v3 = vpop.xlane.xlu1 %1667 }
 0x88d   : > { %v1672_v5 = vmul.f32 0.0078125, %v1668_v3 }
 0x88e   : > { %v1670_v6 = vpop.xlane.xlu0 %1669 }
 0x88f   : > { %v1674_v7 = vsub.f32 %v3582_v14, %v1672_v5  ;;  %v1673_v8 = vmul.f32 0.0078125, %v1670_v6 }
 0x891   : > { %v1675_v9 = vsub.f32 %v3585_v62, %v1673_v8  ;;  %v1676_v10 = vmul.f32 %v1674_v7, %v1674_v7 }
 0x893   : > { %1678 = vadd.xlane.f32.xlu0 %v1676_v10  ;;  %v1677_v11 = vmul.f32 %v1675_v9, %v1675_v9 }
 0x897   : > { %1680 = vadd.xlane.f32.xlu0 %v1677_v11 }
 0x920   : > { %v1679_v28 = vpop.xlane.xlu0 %1678 }
 0x921   : > { %v1682_v29 = vmul.f32 0.0078125, %v1679_v28 }
 0x923   : > { %v1684_v31 = vadd.f32 0.001, %v1682_v29  ;;  %v2321_v29 = vld [vmem:[%s3747_s13] ss:$0 sm:$0xff] }
 0x924   : > { %v1681_v32 = vpop.xlane.xlu0 %1680 }
 0x925   : > { %2729 = vrsqrt.f32 %v1684_v31  ;;  %v1683_v33 = vmul.f32 0.0078125, %v1681_v32 }
 0x927   : > { %v1685_v34 = vadd.f32 0.001, %v1683_v33 }
 0x929   : > { %2731 = vrsqrt.f32 %v1685_v34  ;;  %v2338_v34 = vld [vmem:[%s3748_s8] ss:$0 sm:$0xff] }
 0x92f   : > { %v2730_v35 = vpop.eup %2729 }
 0x930   : > { %v1688_v36 = vmul.f32 %v2730_v35, %v1674_v7 }
 0x932   : > { %v1696_v40 = vmul.f32 %v2303_v37, %v1688_v36 }
 0x933   : > { %v2732_v38 = vpop.eup %2731 }
 0x934   : > { %v1689_v39 = vmul.f32 %v2732_v38, %v1675_v9  ;;  %v1704_v4 = vadd.f32 %v2304_v41, %v1696_v40 }
 0x936   : > { %v1697_v42 = vmul.f32 %v2303_v37, %v1689_v39 }
 0x938   : > { %v1705_v43 = vadd.f32 %v2304_v41, %v1697_v42 }
 0x93a   : > { %v1706_v44 = vpack.c.bf16 %v1705_v43, %v1704_v4 }
 0x93c   : > { %1848 = vmatmul.mubr.bf16.vlgmr.msra.gmra.mrb[28].mxu1 %v1706_v44 }
 0xa0f   : > { %v1849_v0 = vpop.f32.mrb[28].mxu1 }
 0xa10   : > { %v1850_v1 = vadd.f32 %v1849_v0, %v1728_v61  ;;  %v1851_v2 = vpop.f32.mrb[29].mxu1 }
 0xa11   : > { %v1852_v3 = vadd.f32 %v1851_v2, %v1732_v63  ;;  %v1853_v5 = vpop.f32.mrb[30].mxu1 }
 0xa12   : > { %v1863_v6 = vmul.f32 0.70710677, %v1850_v1  ;;  %v1854_v7 = vadd.f32 %v1853_v5, %v1728_v61  ;;  %v1855_v8 = vpop.f32.mrb[31].mxu1  ;;  %v1858_v17 = vmul.f32 0.5, %v1850_v1 }
 0xa13   : > { %v1864_v9 = vmul.f32 0.70710677, %v1852_v3  ;;  %v1856_v10 = vadd.f32 %v1855_v8, %v1732_v63  ;;  %v1859_v20 = vmul.f32 0.5, %v1852_v3 }
 0xa14   : > { %2733 = verf.f32 %v1863_v6  ;;  %v1865_v11 = vmul.f32 0.70710677, %v1854_v7  ;;  %v1860_v18 = vmul.f32 0.5, %v1854_v7 }
 0xa15   : > { %2735 = verf.f32 %v1864_v9  ;;  %v1866_v12 = vmul.f32 0.70710677, %v1856_v10  ;;  %v1861_v21 = vmul.f32 0.5, %v1856_v10 }
 0xa16   : > { %2737 = verf.f32 %v1865_v11 }
 0xa17   : > { %2739 = verf.f32 %v1866_v12 }
 0xa1e   : > { %v2734_v55 = vpop.eup %2733 }
 0xa1f   : > { %v2736_v13 = vpop.eup %2735  ;;  %v1871_v54 = vadd.f32 1.0, %v2734_v55 }
 0xa20   : > { %v2738_v57 = vpop.eup %2737  ;;  %v1872_v15 = vadd.f32 1.0, %v2736_v13 }
 0xa21   : > { %v2740_v16 = vpop.eup %2739  ;;  %v1873_v19 = vadd.f32 1.0, %v2738_v57  ;;  %v1875_v23 = vmul.f32 %v1871_v54, %v1858_v17 }
 0xa22   : > { %v1874_v22 = vadd.f32 1.0, %v2740_v16  ;;  %v1876_v25 = vmul.f32 %v1872_v15, %v1859_v20 }
 0xa23   : > { %v1877_v24 = vmul.f32 %v1873_v19, %v1860_v18 }
 0xa24   : > { %v1878_v30 = vmul.f32 %v1874_v22, %v1861_v21 }
 0xa25   : > { %v1879_v26 = vpack.c.bf16 %v1877_v24, %v1875_v23 }
 0xa26   : > { %v1880_v27 = vpack.c.bf16 %v1878_v30, %v1876_v25 }
 0xa28   : > { %2048 = vmatprep.mubr.bf16.mxu0 %v1880_v27 }
 0xa29   : > { %2049 = vmatmul.mubr.bf16.vlgmr.msra.gmra.mrb[16].mxu0 %v1879_v26 }
 0xafc   : > { %v2397_v28 = vpop.f32.mrb[16].mxu0 }
 0xafd   : > { %v2398_v31 = vpop.f32.mrb[17].mxu0 }
 0xafe   : > { %v2399_v32 = vadd.f32 %v2398_v31, %v2397_v28  ;;  %v2400_v33 = vpop.f32.mrb[18].mxu0 }
 0xaff   : > { %v2401_v35 = vpop.f32.mrb[19].mxu0 }
 0xb00   : > { %v2051_v36 = vadd.f32 %v2399_v32, %v2321_v29  ;;  %v2402_v37 = vadd.f32 %v2401_v35, %v2400_v33 }
 0xb02   : > { %v2064_v38 = vmul.f32 %v2338_v34, %v2051_v36  ;;  %v2054_v39 = vadd.f32 %v2402_v37, %v2321_v29 }
 0xb04   : > { %v2066_v40 = vadd.f32 %v2064_v38, %v3582_v14  ;;  %v2065_v41 = vmul.f32 %v2338_v34, %v2054_v39 }
 0xb06   : > { %2068 = vst [vmem:[%s655_s25] sm:$0xff] %v2066_v40  ;;  %v2067_v42 = vadd.f32 %v2065_v41, %v3585_v62 }
 0xb08   : > { %2069 = vst [vmem:[%s655_s25 + $0x8] sm:$0xff] %v2067_v42 }
 0xb09   : > { %2926 = shalt.err (!%p2923_p6)
}
 0xb0a   : > { %s2927_s9 = scalar_lea.hbm %s3615_s27, 256  ;;  %s2931_s20 = scalar_lea.hbm %s3749_s11, 512 }
 0xb0b   : > { %p2928_p11 = scmp.ne.s32.totalorder %s3615_s27, %s2927_s9  ;;  %p2932_p1 = scmp.lt.u32.totalorder %s3615_s27, %s3749_s11 }
 0xb0c   : > { %p2933_p13 = scmp.lt.u32.totalorder %s2931_s20, %s2927_s9  ;;  %p2935_p2 = scmp.lt.u32.totalorder %s2927_s9, %s3615_s27 }
 0xb0d   : > { %p2929_p9 = pnand %p2928_p11, %p3293_p5 }
 0xb0e   : > { %p2934_p4 = por %p2933_p13, %p2932_p1 }
 0xb0f   : > { %p2930_p0 = pneg %p2929_p9 }
 0xb10   : > { %p2936_p8 = por %p2935_p2, %p2934_p4 }
 0xb12   : > { %p2937_p10 = pnand %p2936_p8, %p2930_p0 }
 0xb14   : > { %2940 = shalt.err (!%p2937_p10)
}
 0xb15   : > { %s3032_s21 = smov 128   ;;  %s3033_s8 = smov 8  }
 0xb16   : > { %2511 = dma.vmem_to_hbm [thread:$0]  (%p3293_p5), %s3617_s17, 256, %s3615_s27, %s2071_s16, %s3032_s21, %s3032_s21, %s3033_s8  }
 0xb17 PF: > { %s3750_s25 = sld [smem:[#allocation25_spill]]  ;;  %s3751_s0 = sld [smem:[#allocation28_spill]] }
 0xb18   : > { %p3753_p7 = scmp.ge.s32.totalorder %s3011_s26, 2 }
 0xb1d   : > { %s2101_s14 = sand.u32 1, %s3750_s25   ;;  %p3752_p3 = scmp.ne.s32.totalorder %s3751_s0, 0 }
 0xb1e   : > { %s2102_s28 = scalar_lea.sflag [#allocation9], %s2101_s14 }
 0xb1f   : > { %p2534_p12 = pnand %p3753_p7, %p3752_p3 }
 0xb21   : > { %2986 = dma.done.wait (!%p2534_p12), %s2102_s28, 256  }
 0xb22   : > { %2988 = vsyncadd (!%p2534_p12), %s2102_s28, 4294967040  ;;  %s37_s26 = sadd.s32 1, %s3011_s26   ;;  %s3754_s24 = sld [smem:[#allocation27_spill]] }
 0xb23   : > { %p34_p6 = scmp.ge.s32.totalorder %s37_s26, 4   ;;  %s3755_s25 = sld [smem:[#allocation29_spill]] }
 0xb24   : > { %s3756_s21 = smov %s2995_s22  ;;  %s3757_s22 = smov %s2999_s23 }
 0xb25   : > { %s3758_s23 = smov %s3304_s18  ;;  %36 = sbr.rel (!%p34_p6) target bundleno = 23 (0x17), region = 172 }
 0xb2c   :  { %2107 = vsyncpa [#allocation8], 1 }
 0xb2d   :  { %2109 = vsyncpa [#allocation8 + $0x1], 1 }
 0xb2e   :  { %2110 = vsyncpa [#allocation11], 1 }
 0xb2f   :  { %2112 = vsyncpa [#allocation11 + $0x1], 1 }
 0xb30   :  { %2113 = vsyncpa [#allocation14], 1 }
 0xb31   :  { %2114 = vsyncpa [#allocation17], 1 }
 0xb32   :  { %2115 = vsyncpa [#allocation9], 1 }
 0xb33   :  { %2117 = vsyncpa [#allocation9 + $0x1], 1 }

</bundles_post_ra>
